<compile_context>
chip_gen: v5e
topology: v5e:2x2
jax: 0.10.0
libtpu: 0.0.40
codegen_flags: <defaults>
</compile_context>

<pallas_src>
import jax
import jax.numpy as jnp
from jax.experimental import pallas as pl
from jax.experimental.pallas import tpu as pltpu

K = 3
STRIDE = 2
PAD = 1
EPS = 1e-5
INV_SQRT2 = 0.7071067811865476
MATMUL_DTYPE = jnp.bfloat16        # conv inputs only; stats/norm/GELU stay f32
S_TARGET = 2048                    # target spatial rows per tile
VMEM_LIMIT = 48 * 1024 * 1024      # fits v7x's 64 MiB physical VMEM with headroom


def _pick_tile_rows(OH, OW):
    """Largest TOH dividing OH with TOH*OW <= S_TARGET and lane-dense blocks."""
    if OH * OW <= S_TARGET:
        return OH
    limit = max(1, S_TARGET // OW)
    for t in range(min(limit, OH), 0, -1):
        if OH % t == 0 and (t * OW) % 128 == 0:
            return t
    return OH  # fallback: whole image in one tile (still correct)


def down_scale(x_nchw, weight):
    """x: (N, C, H, W) f32; weight: (2C, C, 3, 3) f32 -> (N, 2C, OH, OW) f32."""
    N, C, H, W = x_nchw.shape
    OC = weight.shape[0]
    assert OC == 2 * C and weight.shape[1:] == (C, K, K)
    OH = (H + 2 * PAD - K) // STRIDE + 1
    OW = (W + 2 * PAD - K) // STRIDE + 1
    OHW = OH * OW

    TOH = _pick_tile_rows(OH, OW)   # output rows per spatial tile
    Tt = OH // TOH                  # number of spatial tiles
    S = TOH * OW                    # spatial positions per tile

    # ---- glue: pad + parity split (space-to-depth by the stride), cast bf16 ----
    x_nhwc = jnp.transpose(x_nchw, (0, 2, 3, 1))
    xp = jnp.pad(x_nhwc, ((0, 0), (PAD, PAD), (PAD, PAD), (0, 0)))
    parts = []
    for di in (0, 1):
        for dj in (0, 1):
            s = xp[:, di::2, dj::2, :]
            s = jnp.pad(s, ((0, 0), (0, OH + 1 - s.shape[1]),
                            (0, OW + 1 - s.shape[2]), (0, 0)))
            parts.append(s)
    xsplit = jnp.stack(parts, axis=1)            # (N, 4, OH+1, OW+1, C)

    # Pre-tile the row axis with its +1 halo baked in (duplicates 1 row per tile,
    # keeps every kernel-side access a contiguous static slice, no strided loads).
    xtiles = jnp.stack(
        [xsplit[:, :, t * TOH: t * TOH + TOH + 1] for t in range(Tt)], axis=1)
    xtiles = xtiles.reshape(N, Tt, 4 * (TOH + 1), OW + 1, C).astype(MATMUL_DTYPE)

    # Weight per tap: (OC, C, kh, kw) -> (kh*kw, C, OC), bf16 for the MXU.
    w_taps = jnp.transpose(weight, (2, 3, 1, 0)).reshape(K * K, C, OC)
    w_taps = w_taps.astype(MATMUL_DTYPE)

    # ---- kernel 1: conv as 9 accumulated matmuls + per-tile sum / sumsq --------
    def conv_kernel(x_ref, w_ref, yT_ref, st_ref):
        acc = jnp.zeros((S, OC), jnp.float32)
        for ki in range(K):
            for kj in range(K):
                p = (ki % 2) * 2 + (kj % 2)          # parity plane
                r0 = p * (TOH + 1) + ki // 2         # static row offset
                c0 = kj // 2                         # static col offset
                lhs = x_ref[0, 0, r0:r0 + TOH, c0:c0 + OW, :].reshape(S, C)
                acc = acc + jnp.dot(lhs, w_ref[ki * K + kj],
                                    preferred_element_type=jnp.float32)
        # Per-tile partial statistics (f32) for the two-stage InstanceNorm.
        st_ref[0, 0, 0:1, :] = jnp.sum(acc, axis=0, keepdims=True)
        st_ref[0, 0, 1:2, :] = jnp.sum(acc * acc, axis=0, keepdims=True)
        # Store channel-major so the final output is already NCHW (lane dim = S).
        yT_ref[0] = acc.T

    yT, stats = pl.pallas_call(
        conv_kernel,
        out_shape=(jax.ShapeDtypeStruct((N, OC, OHW), jnp.float32),
                   jax.ShapeDtypeStruct((N, Tt, 2, OC), jnp.float32)),
        grid=(N, Tt),
        in_specs=[
            pl.BlockSpec((1, 1, 4 * (TOH + 1), OW + 1, C),
                         lambda n, t: (n, t, 0, 0, 0)),
            pl.BlockSpec((K * K, C, OC), lambda n, t: (0, 0, 0)),
        ],
        out_specs=(
            pl.BlockSpec((1, OC, S), lambda n, t: (n, 0, t)),
            pl.BlockSpec((1, 1, 2, OC), lambda n, t: (n, t, 0, 0)),
        ),
        compiler_params=pltpu.CompilerParams(
            dimension_semantics=("parallel", "parallel"),
            vmem_limit_bytes=VMEM_LIMIT),
    )(xtiles, w_taps)

    # ---- glue: tiny global reduction over tiles -> mean / rstd per (n, c) ------
    tot = jnp.sum(stats, axis=1)                       # (N, 2, OC)
    mean = tot[:, 0, :] / float(OHW)
    var = jnp.maximum(tot[:, 1, :] / float(OHW) - mean * mean, 0.0)
    rstd = jax.lax.rsqrt(var + EPS)
    mean = mean[:, :, None]                            # (N, OC, 1)
    rstd = rstd[:, :, None]

    # ---- kernel 2: normalize + exact-erf GELU (elementwise, f32) ---------------
    def norm_gelu_kernel(y_ref, m_ref, r_ref, o_ref):
        yn = (y_ref[0] - m_ref[0]) * r_ref[0]
        o_ref[0] = 0.5 * yn * (1.0 + jax.lax.erf(yn * INV_SQRT2))

    out = pl.pallas_call(
        norm_gelu_kernel,
        out_shape=jax.ShapeDtypeStruct((N, OC, OHW), jnp.float32),
        grid=(N, Tt),
        in_specs=[
            pl.BlockSpec((1, OC, S), lambda n, t: (n, 0, t)),
            pl.BlockSpec((1, OC, 1), lambda n, t: (n, 0, 0)),
            pl.BlockSpec((1, OC, 1), lambda n, t: (n, 0, 0)),
        ],
        out_specs=pl.BlockSpec((1, OC, S), lambda n, t: (n, 0, t)),
        compiler_params=pltpu.CompilerParams(
            dimension_semantics=("parallel", "parallel"),
            vmem_limit_bytes=VMEM_LIMIT),
    )(yT, mean, rstd)

    return out.reshape(N, OC, OH, OW)                  # already NCHW: free reshape


def _reference(x, w):
    """Pure-XLA reference: Conv2d(s=2,p=1,no bias) -> InstanceNorm2d -> exact GELU."""
    y = jax.lax.conv_general_dilated(
        x, w, window_strides=(STRIDE, STRIDE), padding=((PAD, PAD), (PAD, PAD)),
        dimension_numbers=("NCHW", "OIHW", "NCHW"))
    mean = jnp.mean(y, axis=(2, 3), keepdims=True)
    var = jnp.mean(jnp.square(y - mean), axis=(2, 3), keepdims=True)
    yn = (y - mean) * jax.lax.rsqrt(var + EPS)
    return 0.5 * yn * (1.0 + jax.lax.erf(yn * INV_SQRT2))


if __name__ == "__main__":
    key = jax.random.PRNGKey(0)
    kx, kw = jax.random.split(key)

    N, C, H, W = 2, 4, 16, 16
    OC = 2 * C

    x = jax.random.normal(kx, (N, C, H, W), dtype=jnp.float32)
    weight = 0.1 * jax.random.normal(kw, (OC, C, K, K), dtype=jnp.float32)

    y = jax.jit(down_scale)(x, weight)
    jax.block_until_ready(y)
    assert y.shape == (N, OC, H // 2, W // 2), y.shape

    # Self-check (loose tolerance: conv inputs are bf16 by design).
    y_ref = _reference(x, weight)
    err = float(jnp.max(jnp.abs(y - y_ref)))
    assert err < 5e-2, f"max abs err {err}"
    print("KERNEL_OK")
</pallas_src>

<mosaic_0001>
module attributes {stable_mosaic.version = 11 : i64} {
  func.func @conv_kernel(%arg0: i32, %arg1: i32, %arg2: memref<1x1x36x9x4xbf16, #tpu.memory_space<vmem>>, %arg3: memref<9x4x8xbf16, #tpu.memory_space<vmem>>, %arg4: memref<1x8x64xf32, #tpu.memory_space<vmem>>, %arg5: memref<1x1x2x8xf32, #tpu.memory_space<vmem>>) attributes {dimension_semantics = [#tpu.dimension_semantics<parallel>, #tpu.dimension_semantics<parallel>], iteration_bounds = array<i64: 2, 1>, scalar_prefetch = 0 : i64, scratch_operands = 0 : i64, tpu.core_type = #tpu.core_type<tc>, window_params = [{transform_indices = @transform_0, window_bounds = array<i64: 1, 1, 36, 9, 4>}, {pipeline_mode = #tpu.pipeline_mode<synchronous>, transform_indices = @transform_1, window_bounds = array<i64: 9, 4, 8>}, {transform_indices = @transform_2, window_bounds = array<i64: 1, 8, 64>}, {transform_indices = @transform_3, window_bounds = array<i64: 1, 1, 2, 8>}]} {
    %cst = arith.constant 0.000000e+00 : f32
    %0 = vector.broadcast %cst : f32 to vector<64x8xf32>
    %c0 = arith.constant 0 : index
    %c0_0 = arith.constant 0 : index
    %c0_1 = arith.constant 0 : index
    %c0_2 = arith.constant 0 : index
    %c0_3 = arith.constant 0 : index
    %1 = vector.load %arg2[%c0, %c0_0, %c0_1, %c0_2, %c0_3] : memref<1x1x36x9x4xbf16, #tpu.memory_space<vmem>>, vector<1x1x8x8x4xbf16>
    %2 = vector.shape_cast %1 : vector<1x1x8x8x4xbf16> to vector<8x8x4xbf16>
    %3 = vector.shape_cast %2 : vector<8x8x4xbf16> to vector<64x4xbf16>
    %c0_4 = arith.constant 0 : index
    %c0_5 = arith.constant 0 : index
    %c0_6 = arith.constant 0 : index
    %4 = vector.load %arg3[%c0_4, %c0_5, %c0_6] : memref<9x4x8xbf16, #tpu.memory_space<vmem>>, vector<1x4x8xbf16>
    %5 = vector.shape_cast %4 : vector<1x4x8xbf16> to vector<4x8xbf16>
    %cst_7 = arith.constant dense<0.000000e+00> : vector<64x8xf32>
    %6 = tpu.matmul %3, %5, %cst_7 {dimension_numbers = #tpu.dot_dimension_numbers<[1], [0], [0], [1], [0, 0, 1, 1], [], []>} : vector<64x4xbf16>, vector<4x8xbf16>, vector<64x8xf32> -> vector<64x8xf32>
    %7 = arith.addf %0, %6 : vector<64x8xf32>
    %c0_8 = arith.constant 0 : index
    %c0_9 = arith.constant 0 : index
    %c9 = arith.constant 9 : index
    %c0_10 = arith.constant 0 : index
    %c0_11 = arith.constant 0 : index
    %8 = vector.load %arg2[%c0_8, %c0_9, %c9, %c0_10, %c0_11] : memref<1x1x36x9x4xbf16, #tpu.memory_space<vmem>>, vector<1x1x8x8x4xbf16>
    %9 = vector.shape_cast %8 : vector<1x1x8x8x4xbf16> to vector<8x8x4xbf16>
    %10 = vector.shape_cast %9 : vector<8x8x4xbf16> to vector<64x4xbf16>
    %c1 = arith.constant 1 : index
    %c0_12 = arith.constant 0 : index
    %c0_13 = arith.constant 0 : index
    %11 = vector.load %arg3[%c1, %c0_12, %c0_13] : memref<9x4x8xbf16, #tpu.memory_space<vmem>>, vector<1x4x8xbf16>
    %12 = vector.shape_cast %11 : vector<1x4x8xbf16> to vector<4x8xbf16>
    %cst_14 = arith.constant dense<0.000000e+00> : vector<64x8xf32>
    %13 = tpu.matmul %10, %12, %cst_14 {dimension_numbers = #tpu.dot_dimension_numbers<[1], [0], [0], [1], [0, 0, 1, 1], [], []>} : vector<64x4xbf16>, vector<4x8xbf16>, vector<64x8xf32> -> vector<64x8xf32>
    %14 = arith.addf %7, %13 : vector<64x8xf32>
    %c0_15 = arith.constant 0 : index
    %c0_16 = arith.constant 0 : index
    %c0_17 = arith.constant 0 : index
    %c1_18 = arith.constant 1 : index
    %c0_19 = arith.constant 0 : index
    %15 = vector.load %arg2[%c0_15, %c0_16, %c0_17, %c1_18, %c0_19] : memref<1x1x36x9x4xbf16, #tpu.memory_space<vmem>>, vector<1x1x8x8x4xbf16>
    %16 = vector.shape_cast %15 : vector<1x1x8x8x4xbf16> to vector<8x8x4xbf16>
    %17 = vector.shape_cast %16 : vector<8x8x4xbf16> to vector<64x4xbf16>
    %c2 = arith.constant 2 : index
    %c0_20 = arith.constant 0 : index
    %c0_21 = arith.constant 0 : index
    %18 = vector.load %arg3[%c2, %c0_20, %c0_21] : memref<9x4x8xbf16, #tpu.memory_space<vmem>>, vector<1x4x8xbf16>
    %19 = vector.shape_cast %18 : vector<1x4x8xbf16> to vector<4x8xbf16>
    %cst_22 = arith.constant dense<0.000000e+00> : vector<64x8xf32>
    %20 = tpu.matmul %17, %19, %cst_22 {dimension_numbers = #tpu.dot_dimension_numbers<[1], [0], [0], [1], [0, 0, 1, 1], [], []>} : vector<64x4xbf16>, vector<4x8xbf16>, vector<64x8xf32> -> vector<64x8xf32>
    %21 = arith.addf %14, %20 : vector<64x8xf32>
    %c0_23 = arith.constant 0 : index
    %c0_24 = arith.constant 0 : index
    %c18 = arith.constant 18 : index
    %c0_25 = arith.constant 0 : index
    %c0_26 = arith.constant 0 : index
    %22 = vector.load %arg2[%c0_23, %c0_24, %c18, %c0_25, %c0_26] : memref<1x1x36x9x4xbf16, #tpu.memory_space<vmem>>, vector<1x1x8x8x4xbf16>
    %23 = vector.shape_cast %22 : vector<1x1x8x8x4xbf16> to vector<8x8x4xbf16>
    %24 = vector.shape_cast %23 : vector<8x8x4xbf16> to vector<64x4xbf16>
    %c3 = arith.constant 3 : index
    %c0_27 = arith.constant 0 : index
    %c0_28 = arith.constant 0 : index
    %25 = vector.load %arg3[%c3, %c0_27, %c0_28] : memref<9x4x8xbf16, #tpu.memory_space<vmem>>, vector<1x4x8xbf16>
    %26 = vector.shape_cast %25 : vector<1x4x8xbf16> to vector<4x8xbf16>
    %cst_29 = arith.constant dense<0.000000e+00> : vector<64x8xf32>
    %27 = tpu.matmul %24, %26, %cst_29 {dimension_numbers = #tpu.dot_dimension_numbers<[1], [0], [0], [1], [0, 0, 1, 1], [], []>} : vector<64x4xbf16>, vector<4x8xbf16>, vector<64x8xf32> -> vector<64x8xf32>
    %28 = arith.addf %21, %27 : vector<64x8xf32>
    %c0_30 = arith.constant 0 : index
    %c0_31 = arith.constant 0 : index
    %c27 = arith.constant 27 : index
    %c0_32 = arith.constant 0 : index
    %c0_33 = arith.constant 0 : index
    %29 = vector.load %arg2[%c0_30, %c0_31, %c27, %c0_32, %c0_33] : memref<1x1x36x9x4xbf16, #tpu.memory_space<vmem>>, vector<1x1x8x8x4xbf16>
    %30 = vector.shape_cast %29 : vector<1x1x8x8x4xbf16> to vector<8x8x4xbf16>
    %31 = vector.shape_cast %30 : vector<8x8x4xbf16> to vector<64x4xbf16>
    %c4 = arith.constant 4 : index
    %c0_34 = arith.constant 0 : index
    %c0_35 = arith.constant 0 : index
    %32 = vector.load %arg3[%c4, %c0_34, %c0_35] : memref<9x4x8xbf16, #tpu.memory_space<vmem>>, vector<1x4x8xbf16>
    %33 = vector.shape_cast %32 : vector<1x4x8xbf16> to vector<4x8xbf16>
    %cst_36 = arith.constant dense<0.000000e+00> : vector<64x8xf32>
    %34 = tpu.matmul %31, %33, %cst_36 {dimension_numbers = #tpu.dot_dimension_numbers<[1], [0], [0], [1], [0, 0, 1, 1], [], []>} : vector<64x4xbf16>, vector<4x8xbf16>, vector<64x8xf32> -> vector<64x8xf32>
    %35 = arith.addf %28, %34 : vector<64x8xf32>
    %c0_37 = arith.constant 0 : index
    %c0_38 = arith.constant 0 : index
    %c18_39 = arith.constant 18 : index
    %c1_40 = arith.constant 1 : index
    %c0_41 = arith.constant 0 : index
    %36 = vector.load %arg2[%c0_37, %c0_38, %c18_39, %c1_40, %c0_41] : memref<1x1x36x9x4xbf16, #tpu.memory_space<vmem>>, vector<1x1x8x8x4xbf16>
    %37 = vector.shape_cast %36 : vector<1x1x8x8x4xbf16> to vector<8x8x4xbf16>
    %38 = vector.shape_cast %37 : vector<8x8x4xbf16> to vector<64x4xbf16>
    %c5 = arith.constant 5 : index
    %c0_42 = arith.constant 0 : index
    %c0_43 = arith.constant 0 : index
    %39 = vector.load %arg3[%c5, %c0_42, %c0_43] : memref<9x4x8xbf16, #tpu.memory_space<vmem>>, vector<1x4x8xbf16>
    %40 = vector.shape_cast %39 : vector<1x4x8xbf16> to vector<4x8xbf16>
    %cst_44 = arith.constant dense<0.000000e+00> : vector<64x8xf32>
    %41 = tpu.matmul %38, %40, %cst_44 {dimension_numbers = #tpu.dot_dimension_numbers<[1], [0], [0], [1], [0, 0, 1, 1], [], []>} : vector<64x4xbf16>, vector<4x8xbf16>, vector<64x8xf32> -> vector<64x8xf32>
    %42 = arith.addf %35, %41 : vector<64x8xf32>
    %c0_45 = arith.constant 0 : index
    %c0_46 = arith.constant 0 : index
    %c1_47 = arith.constant 1 : index
    %c0_48 = arith.constant 0 : index
    %c0_49 = arith.constant 0 : index
    %43 = vector.load %arg2[%c0_45, %c0_46, %c1_47, %c0_48, %c0_49] : memref<1x1x36x9x4xbf16, #tpu.memory_space<vmem>>, vector<1x1x8x8x4xbf16>
    %44 = vector.shape_cast %43 : vector<1x1x8x8x4xbf16> to vector<8x8x4xbf16>
    %45 = vector.shape_cast %44 : vector<8x8x4xbf16> to vector<64x4xbf16>
    %c6 = arith.constant 6 : index
    %c0_50 = arith.constant 0 : index
    %c0_51 = arith.constant 0 : index
    %46 = vector.load %arg3[%c6, %c0_50, %c0_51] : memref<9x4x8xbf16, #tpu.memory_space<vmem>>, vector<1x4x8xbf16>
    %47 = vector.shape_cast %46 : vector<1x4x8xbf16> to vector<4x8xbf16>
    %cst_52 = arith.constant dense<0.000000e+00> : vector<64x8xf32>
    %48 = tpu.matmul %45, %47, %cst_52 {dimension_numbers = #tpu.dot_dimension_numbers<[1], [0], [0], [1], [0, 0, 1, 1], [], []>} : vector<64x4xbf16>, vector<4x8xbf16>, vector<64x8xf32> -> vector<64x8xf32>
    %49 = arith.addf %42, %48 : vector<64x8xf32>
    %c0_53 = arith.constant 0 : index
    %c0_54 = arith.constant 0 : index
    %c10 = arith.constant 10 : index
    %c0_55 = arith.constant 0 : index
    %c0_56 = arith.constant 0 : index
    %50 = vector.load %arg2[%c0_53, %c0_54, %c10, %c0_55, %c0_56] : memref<1x1x36x9x4xbf16, #tpu.memory_space<vmem>>, vector<1x1x8x8x4xbf16>
    %51 = vector.shape_cast %50 : vector<1x1x8x8x4xbf16> to vector<8x8x4xbf16>
    %52 = vector.shape_cast %51 : vector<8x8x4xbf16> to vector<64x4xbf16>
    %c7 = arith.constant 7 : index
    %c0_57 = arith.constant 0 : index
    %c0_58 = arith.constant 0 : index
    %53 = vector.load %arg3[%c7, %c0_57, %c0_58] : memref<9x4x8xbf16, #tpu.memory_space<vmem>>, vector<1x4x8xbf16>
    %54 = vector.shape_cast %53 : vector<1x4x8xbf16> to vector<4x8xbf16>
    %cst_59 = arith.constant dense<0.000000e+00> : vector<64x8xf32>
    %55 = tpu.matmul %52, %54, %cst_59 {dimension_numbers = #tpu.dot_dimension_numbers<[1], [0], [0], [1], [0, 0, 1, 1], [], []>} : vector<64x4xbf16>, vector<4x8xbf16>, vector<64x8xf32> -> vector<64x8xf32>
    %56 = arith.addf %49, %55 : vector<64x8xf32>
    %c0_60 = arith.constant 0 : index
    %c0_61 = arith.constant 0 : index
    %c1_62 = arith.constant 1 : index
    %c1_63 = arith.constant 1 : index
    %c0_64 = arith.constant 0 : index
    %57 = vector.load %arg2[%c0_60, %c0_61, %c1_62, %c1_63, %c0_64] : memref<1x1x36x9x4xbf16, #tpu.memory_space<vmem>>, vector<1x1x8x8x4xbf16>
    %58 = vector.shape_cast %57 : vector<1x1x8x8x4xbf16> to vector<8x8x4xbf16>
    %59 = vector.shape_cast %58 : vector<8x8x4xbf16> to vector<64x4xbf16>
    %c8 = arith.constant 8 : index
    %c0_65 = arith.constant 0 : index
    %c0_66 = arith.constant 0 : index
    %60 = vector.load %arg3[%c8, %c0_65, %c0_66] : memref<9x4x8xbf16, #tpu.memory_space<vmem>>, vector<1x4x8xbf16>
    %61 = vector.shape_cast %60 : vector<1x4x8xbf16> to vector<4x8xbf16>
    %cst_67 = arith.constant dense<0.000000e+00> : vector<64x8xf32>
    %62 = tpu.matmul %59, %61, %cst_67 {dimension_numbers = #tpu.dot_dimension_numbers<[1], [0], [0], [1], [0, 0, 1, 1], [], []>} : vector<64x4xbf16>, vector<4x8xbf16>, vector<64x8xf32> -> vector<64x8xf32>
    %63 = arith.addf %56, %62 : vector<64x8xf32>
    %cst_68 = arith.constant dense<0.000000e+00> : vector<8xf32>
    %64 = vector.multi_reduction <add>, %63, %cst_68 [0] : vector<64x8xf32> to vector<8xf32>
    %65 = vector.shape_cast %64 : vector<8xf32> to vector<1x8xf32>
    %c0_69 = arith.constant 0 : index
    %c0_70 = arith.constant 0 : index
    %c0_71 = arith.constant 0 : index
    %c0_72 = arith.constant 0 : index
    %66 = vector.load %arg5[%c0_69, %c0_70, %c0_71, %c0_72] : memref<1x1x2x8xf32, #tpu.memory_space<vmem>>, vector<1x1x1x8xf32>
    %67 = vector.shape_cast %66 : vector<1x1x1x8xf32> to vector<1x8xf32>
    %68 = vector.shape_cast %65 : vector<1x8xf32> to vector<1x1x1x8xf32>
    tpu.vector_store %arg5[%c0_69, %c0_70, %c0_71, %c0_72], %68 {strides = array<i32>} : memref<1x1x2x8xf32, #tpu.memory_space<vmem>>, vector<1x1x1x8xf32>,
    %69 = arith.mulf %63, %63 : vector<64x8xf32>
    %cst_73 = arith.constant dense<0.000000e+00> : vector<8xf32>
    %70 = vector.multi_reduction <add>, %69, %cst_73 [0] : vector<64x8xf32> to vector<8xf32>
    %71 = vector.shape_cast %70 : vector<8xf32> to vector<1x8xf32>
    %c0_74 = arith.constant 0 : index
    %c0_75 = arith.constant 0 : index
    %c1_76 = arith.constant 1 : index
    %c0_77 = arith.constant 0 : index
    %72 = vector.load %arg5[%c0_74, %c0_75, %c1_76, %c0_77] : memref<1x1x2x8xf32, #tpu.memory_space<vmem>>, vector<1x1x1x8xf32>
    %73 = vector.shape_cast %72 : vector<1x1x1x8xf32> to vector<1x8xf32>
    %74 = vector.shape_cast %71 : vector<1x8xf32> to vector<1x1x1x8xf32>
    tpu.vector_store %arg5[%c0_74, %c0_75, %c1_76, %c0_77], %74 {strides = array<i32>} : memref<1x1x2x8xf32, #tpu.memory_space<vmem>>, vector<1x1x1x8xf32>,
    %75 = tpu.transpose %63, [1, 0] : vector<64x8xf32> -> vector<8x64xf32>
    %c0_78 = arith.constant 0 : index
    %c0_79 = arith.constant 0 : index
    %c0_80 = arith.constant 0 : index
    %76 = vector.load %arg4[%c0_78, %c0_79, %c0_80] : memref<1x8x64xf32, #tpu.memory_space<vmem>>, vector<1x8x64xf32>
    %77 = vector.shape_cast %76 : vector<1x8x64xf32> to vector<8x64xf32>
    %78 = vector.shape_cast %75 : vector<8x64xf32> to vector<1x8x64xf32>
    tpu.vector_store %arg4[%c0_78, %c0_79, %c0_80], %78 {strides = array<i32>} : memref<1x8x64xf32, #tpu.memory_space<vmem>>, vector<1x8x64xf32>,
    return
  }
  func.func @transform_0(%arg0: i32, %arg1: i32) -> (i32, i32, i32, i32, i32) {
    %c0_i32 = arith.constant 0 : i32
    %c0_i32_0 = arith.constant 0 : i32
    %c0_i32_1 = arith.constant 0 : i32
    %c0_i32_2 = arith.constant 0 : i32
    return %arg0, %arg1, %c0_i32, %c0_i32_0, %c0_i32_1 : i32, i32, i32, i32, i32
  }
  func.func @transform_1(%arg0: i32, %arg1: i32) -> (i32, i32, i32) {
    %c0_i32 = arith.constant 0 : i32
    %c0_i32_0 = arith.constant 0 : i32
    %c0_i32_1 = arith.constant 0 : i32
    %c0_i32_2 = arith.constant 0 : i32
    return %c0_i32, %c0_i32_0, %c0_i32_1 : i32, i32, i32
  }
  func.func @transform_2(%arg0: i32, %arg1: i32) -> (i32, i32, i32) {
    %c0_i32 = arith.constant 0 : i32
    %c0_i32_0 = arith.constant 0 : i32
    return %arg0, %c0_i32, %arg1 : i32, i32, i32
  }
  func.func @transform_3(%arg0: i32, %arg1: i32) -> (i32, i32, i32, i32) {
    %c0_i32 = arith.constant 0 : i32
    %c0_i32_0 = arith.constant 0 : i32
    %c0_i32_1 = arith.constant 0 : i32
    return %arg0, %arg1, %c0_i32, %c0_i32_0 : i32, i32, i32, i32
  }
}

module attributes {stable_mosaic.version = 11 : i64} {
  func.func @norm_gelu_kernel(%arg0: i32, %arg1: i32, %arg2: memref<1x8x64xf32, #tpu.memory_space<vmem>>, %arg3: memref<1x8x1xf32, #tpu.memory_space<vmem>>, %arg4: memref<1x8x1xf32, #tpu.memory_space<vmem>>, %arg5: memref<1x8x64xf32, #tpu.memory_space<vmem>>) attributes {dimension_semantics = [#tpu.dimension_semantics<parallel>, #tpu.dimension_semantics<parallel>], iteration_bounds = array<i64: 2, 1>, scalar_prefetch = 0 : i64, scratch_operands = 0 : i64, tpu.core_type = #tpu.core_type<tc>, window_params = [{transform_indices = @transform_0, window_bounds = array<i64: 1, 8, 64>}, {transform_indices = @transform_1, window_bounds = array<i64: 1, 8, 1>}, {transform_indices = @transform_2, window_bounds = array<i64: 1, 8, 1>}, {transform_indices = @transform_3, window_bounds = array<i64: 1, 8, 64>}]} {
    %c0 = arith.constant 0 : index
    %c0_0 = arith.constant 0 : index
    %c0_1 = arith.constant 0 : index
    %0 = vector.load %arg2[%c0, %c0_0, %c0_1] : memref<1x8x64xf32, #tpu.memory_space<vmem>>, vector<1x8x64xf32>
    %1 = vector.shape_cast %0 : vector<1x8x64xf32> to vector<8x64xf32>
    %c0_2 = arith.constant 0 : index
    %c0_3 = arith.constant 0 : index
    %c0_4 = arith.constant 0 : index
    %2 = vector.load %arg3[%c0_2, %c0_3, %c0_4] : memref<1x8x1xf32, #tpu.memory_space<vmem>>, vector<1x8x1xf32>
    %3 = vector.shape_cast %2 : vector<1x8x1xf32> to vector<8x1xf32>
    %4 = vector.broadcast %3 : vector<8x1xf32> to vector<8x64xf32>
    %5 = arith.subf %1, %4 : vector<8x64xf32>
    %c0_5 = arith.constant 0 : index
    %c0_6 = arith.constant 0 : index
    %c0_7 = arith.constant 0 : index
    %6 = vector.load %arg4[%c0_5, %c0_6, %c0_7] : memref<1x8x1xf32, #tpu.memory_space<vmem>>, vector<1x8x1xf32>
    %7 = vector.shape_cast %6 : vector<1x8x1xf32> to vector<8x1xf32>
    %8 = vector.broadcast %7 : vector<8x1xf32> to vector<8x64xf32>
    %9 = arith.mulf %5, %8 : vector<8x64xf32>
    %cst = arith.constant 5.000000e-01 : f32
    %10 = vector.broadcast %cst : f32 to vector<8x64xf32>
    %11 = arith.mulf %10, %9 : vector<8x64xf32>
    %cst_8 = arith.constant 0.707106769 : f32
    %12 = vector.broadcast %cst_8 : f32 to vector<8x64xf32>
    %13 = arith.mulf %9, %12 : vector<8x64xf32>
    %14 = math.erf %13 : vector<8x64xf32>
    %cst_9 = arith.constant 1.000000e+00 : f32
    %15 = vector.broadcast %cst_9 : f32 to vector<8x64xf32>
    %16 = arith.addf %15, %14 : vector<8x64xf32>
    %17 = arith.mulf %11, %16 : vector<8x64xf32>
    %c0_10 = arith.constant 0 : index
    %c0_11 = arith.constant 0 : index
    %c0_12 = arith.constant 0 : index
    %18 = vector.load %arg5[%c0_10, %c0_11, %c0_12] : memref<1x8x64xf32, #tpu.memory_space<vmem>>, vector<1x8x64xf32>
    %19 = vector.shape_cast %18 : vector<1x8x64xf32> to vector<8x64xf32>
    %20 = vector.shape_cast %17 : vector<8x64xf32> to vector<1x8x64xf32>
    tpu.vector_store %arg5[%c0_10, %c0_11, %c0_12], %20 {strides = array<i32>} : memref<1x8x64xf32, #tpu.memory_space<vmem>>, vector<1x8x64xf32>,
    return
  }
  func.func @transform_0(%arg0: i32, %arg1: i32) -> (i32, i32, i32) {
    %c0_i32 = arith.constant 0 : i32
    %c0_i32_0 = arith.constant 0 : i32
    return %arg0, %c0_i32, %arg1 : i32, i32, i32
  }
  func.func @transform_1(%arg0: i32, %arg1: i32) -> (i32, i32, i32) {
    %c0_i32 = arith.constant 0 : i32
    %c0_i32_0 = arith.constant 0 : i32
    %c0_i32_1 = arith.constant 0 : i32
    return %arg0, %c0_i32, %c0_i32_0 : i32, i32, i32
  }
  func.func @transform_2(%arg0: i32, %arg1: i32) -> (i32, i32, i32) {
    %c0_i32 = arith.constant 0 : i32
    %c0_i32_0 = arith.constant 0 : i32
    %c0_i32_1 = arith.constant 0 : i32
    return %arg0, %c0_i32, %c0_i32_0 : i32, i32, i32
  }
  func.func @transform_3(%arg0: i32, %arg1: i32) -> (i32, i32, i32) {
    %c0_i32 = arith.constant 0 : i32
    %c0_i32_0 = arith.constant 0 : i32
    return %arg0, %c0_i32, %arg1 : i32, i32, i32
  }
}

</mosaic_0001>

<bundles_post_ra>
// kernel: mul.0
= control target key start
LH: loop header
LB: loop body
LE: loop exit
PB: predicated region body
PF: predicated region fallthrough
CT: control target
= control target key end

     0   :  { %s34_s0 = inlined_call_operand.vmem [shape: f32[2,8,1], index: 0, kind: input, shape index: {}, may-alias: {0,1}]   ;;  %s35_s1 = inlined_call_operand.vmem [shape: f32[2,8,1], index: 1, kind: input, shape index: {}, may-alias: {0,1}]   ;;  %s36_s2 = inlined_call_operand.vmem [shape: f32[2,8,1], index: 2, kind: output, shape index: {}]  }
   0x1   :  { %v3_v0 = vld [vmem:[%s34_s0] sm:$0x3] }
   0x2   :  { %v4_v1 = vld [vmem:[%s35_s1] sm:$0x3] }
   0x3   :  { %v7_v2 = vmul.f32 %v4_v1, %v3_v0 }
   0x5   :  { %9 = vst [vmem:[%s36_s2] sm:$0x3] %v7_v2 }

// kernel: down_scale.3
= control target key start
LH: loop header
LB: loop body
LE: loop exit
PB: predicated region body
PF: predicated region fallthrough
CT: control target
= control target key end

     0   :  { %s475_s12 = smov 0   ;;  %s477_s13 = smov 0   ;;  %s520_s0 = inlined_call_operand.vmem [shape: f32[2,8,64], index: 0, kind: input, shape index: {}]   ;;  %s521_s1 = inlined_call_operand.vmem [shape: f32[2,8,1], index: 1, kind: input, shape index: {}]   ;;  %s522_s2 = inlined_call_operand.vmem [shape: f32[2,8,1], index: 2, kind: input, shape index: {}]   ;;  %s523_s3 = inlined_call_operand.vmem [shape: f32[2,8,64], index: 3, kind: output, shape index: {}]  }
   0x1   :  { %s479_s14 = smov 0  }
   0x2 LB: > { %s25_s15 = sadd.s32 1, %s448_s13  ;;  %p394_p0 = scmp.ge.s32.totalorder %s452_s14, 1  ;;  %s452_s14 = sphi %s479_s14, %s13_s14   ;;  %s448_s13 = sphi %s477_s13, %s525_s13   ;;  %s444_s12 = sphi %s475_s12, %s524_s12  }
   0x3   : > { %p27_p1 = scmp.ge.s32.totalorder %s25_s15, 2  ;;  %p173_p2 = scmp.lt.s32.totalorder %s452_s14, 3 }
   0x5   : > { %s527_s15 = smov (%p27_p1, %s25_s15), 0  ;;  %p174_p3 = pnand %p394_p0, %p173_p2 }
   0x6   : > { %p209_p4 = scmp.lt.s32.totalorder (!%p174_p3), %s444_s12, 1 }
   0x7   : > { %177 = sbr.rel (%p174_p3) target bundleno = 193 (0xc1), region = 32 }
   0xc   : > { %v454_v0 = vmov 0   ;;  %s529_s12 = smov (!%p209_p4, %s444_s12), 1  ;;  %vm290_vm4 = vcmask 523264  }
   0xd   : > { %427 = vset.pattern.permute.xlu0 %v454_v0  ;;  %s493_s16 = sshll.u32 %s529_s12, 3 }
   0xe   : > { %s219_s19 = scalar_lea.vmem %s521_s1, %s493_s16  ;;  %s223_s22 = scalar_lea.vmem %s522_s2, %s493_s16 }
   0xf   : > { %v232_v1 = vld [vmem:[%s219_s19] sm:$0xff]  ;;  %s215_s25 = scalar_lea.vmem %s520_s0, %s493_s16  ;;  %s230_s28 = scalar_lea.vmem %s523_s3, %s493_s16 }
  0x10   : > { %235 = vperm.xlu0 %427, %v232_v1   ;;  %v239_v2 = vld [vmem:[%s223_s22] sm:$0xff] }
  0x11   : > { %v231_v4 = vld [vmem:[%s215_s25] sm:$0xff] }
  0x18   : > { %242 = vperm.xlu0 %427, %v239_v2  }
  0x82   : > { %v236_v3 = vpop.permute.xlu0 %235 }
  0x83   : > { %v238_v5 = vsub.f32 %v231_v4, %v236_v3 }
  0x8a   : > { %v243_v6 = vpop.permute.xlu0 %242 }
  0x8b   : > { %v245_v7 = vmul.f32 %v243_v6, %v238_v5 }
  0x8d   : > { %v247_v8 = vmul.f32 0.70710677, %v245_v7  ;;  %v246_v44 = vmul.f32 0.5, %v245_v7 }
  0x8f   : > { %v248_v9 = vmul.f32 %v247_v8, %v247_v8 }
  0x91   : > { %v249_v10 = vmin.f32 %v248_v9, 16.0 }
  0x93   : > { %v250_v11 = vmul.f32 2.1237322e-06, %v249_v10  ;;  %v261_v12 = vmul.f32 3.8918573e-05, %v249_v10 }
  0x95   : > { %v251_v13 = vadd.f32 0.00028619796, %v250_v11  ;;  %v262_v14 = vadd.f32 0.001143296, %v261_v12 }
  0x97   : > { %v252_v15 = vmul.f32 %v251_v13, %v249_v10  ;;  %v263_v16 = vmul.f32 %v262_v14, %v249_v10 }
  0x99   : > { %v264_v17 = vadd.f32 0.014752088, %v263_v16  ;;  %v253_v18 = vadd.f32 0.0036580483, %v252_v15 }
  0x9b   : > { %v265_v19 = vmul.f32 %v264_v17, %v249_v10  ;;  %v254_v21 = vmul.f32 %v253_v18, %v249_v10 }
  0x9d   : > { %v266_v20 = vadd.f32 0.112945676, %v265_v19  ;;  %v255_v24 = vadd.f32 0.05243302, %v254_v21 }
  0x9f   : > { %v267_v22 = vmul.f32 %v266_v20, %v249_v10  ;;  %v256_v27 = vmul.f32 %v255_v24, %v249_v10 }
  0xa1   : > { %v268_v23 = vadd.f32 0.4994258, %v267_v22  ;;  %v257_v28 = vadd.f32 0.18741608, %v256_v27 }
  0xa3   : > { %v269_v25 = vmul.f32 %v268_v23, %v249_v10  ;;  %v258_v30 = vmul.f32 %v257_v28, %v249_v10 }
  0xa5   : > { %v270_v26 = vadd.f32 1.0, %v269_v25  ;;  %v259_v34 = vadd.f32 1.1283791, %v258_v30 }
  0xa7   : > { %428 = vrcp.f32 %v270_v26  ;;  %v282_v33 = vand.u32 2147483648, %v270_v26  ;;  %v280_v36 = vand.u32 2147483647, %v270_v26  ;;  %vm276_vm1 = vweird.f32 %v270_v26 }
  0xa8   : > { %v260_v39 = vmul.f32 %v259_v34, %v247_v8 }
  0xa9   : > { %v283_v38 = vor.u32 1.1754944e-38, %v282_v33  ;;  %vm281_vm3 = vcmp.eq.f32.partialorder %v280_v36, 8.507059e+37 }
  0xad   : > { %v429_v29 = vpop.eup %428 }
  0xae   : > { %v272_v31 = vmul.f32 %v429_v29, %v270_v26  ;;  %vm277_vm0 = vweird.f32 %v429_v29 }
  0xaf   : > { %vm278_vm2 = vmor %vm276_vm1, %vm277_vm0 }
  0xb0   : > { %v273_v32 = vsub.f32 1.0, %v272_v31 }
  0xb2   : > { %v274_v35 = vmul.f32 %v429_v29, %v273_v32 }
  0xb4   : > { %v275_v37 = vadd.f32 %v429_v29, %v274_v35 }
  0xb6   : > { %v279_v40 = vsel %vm278_vm2, %v429_v29, %v275_v37 }
  0xb7   : > { %v284_v41 = vsel %vm281_vm3, %v283_v38, %v279_v40 }
  0xb8   : > { %v285_v42 = vmul.f32 %v284_v41, %v260_v39 }
  0xba   : > { %v399_v43 = vclamps-f32 %v285_v42, 1.0 }
  0xbc   : > { %v288_v45 = vadd.f32 1.0, %v399_v43 }
  0xbe   : > { %v289_v46 = vmul.f32 %v288_v45, %v246_v44 }
  0xc0   : > { %291 = vst.msk [vmem:[%s230_s28] sm:$0xff] %vm290_vm4, %v289_v46 }
  0xc1 PF: > { %s13_s14 = sadd.s32 1, %s452_s14   ;;  %s524_s12 = smov %s448_s13 }
  0xc2   : > { %p10_p5 = scmp.ge.s32.totalorder %s13_s14, 4   ;;  %s525_s13 = smov %s527_s15 }
  0xc4   :  { %12 = sbr.rel (!%p10_p5) target bundleno = 2 (0x2), region = 68 }

// kernel: down_scale.2
= control target key start
LH: loop header
LB: loop body
LE: loop exit
PB: predicated region body
PF: predicated region fallthrough
CT: control target
= control target key end

     0   :  { %s1818_s12 = smov 0   ;;  %s1820_s13 = smov 0   ;;  %s2163_s0 = inlined_call_operand.vmem [shape: bf16[2,1,36,9,4], index: 0, kind: input, shape index: {}]   ;;  %s2164_s1 = inlined_call_operand.vmem [shape: bf16[9,4,8], index: 1, kind: input, shape index: {}]   ;;  %s2165_s2 = inlined_call_operand.vmem [shape: f32[2,8,64], index: 2, kind: output, shape index: {0}]   ;;  %s2166_s3 = inlined_call_operand.vmem [shape: f32[2,1,2,8], index: 3, kind: output, shape index: {1}]  }
   0x1   :  { %s1822_s14 = smov 0  }
   0x2 LB: > { %s26_s15 = sadd.s32 1, %s1792_s13  ;;  %p1503_p0 = scmp.ge.s32.totalorder %s1796_s14, 1  ;;  %s1796_s14 = sphi %s1822_s14, %s14_s14   ;;  %s1792_s13 = sphi %s1820_s13, %s2170_s13   ;;  %s1788_s12 = sphi %s1818_s12, %s2169_s12  }
   0x3   : > { %p28_p1 = scmp.ge.s32.totalorder %s26_s15, 2  ;;  %p162_p2 = scmp.lt.s32.totalorder %s1796_s14, 3 }
   0x5   : > { %s2172_s15 = smov (%p28_p1, %s26_s15), 0  ;;  %p163_p3 = pnand %p1503_p0, %p162_p2 }
   0x6   : > { %p199_p4 = scmp.lt.s32.totalorder (!%p163_p3), %s1788_s12, 1 }
   0x7   : > { %166 = sbr.rel (%p163_p3) target bundleno = 405 (0x195), region = 28 }
   0xc   : > { %v1515_v0 = vld [vmem:[%s2164_s1 + $0x2] sm:$0x3]  ;;  %vm276_vm0 = vcmask 1041408   ;;  %v1556_v2 = vld [vmem:[%s2164_s1 + $0x4] sm:$0x3]  ;;  %s2174_s12 = smov (!%p199_p4, %s1788_s12), 1 }
   0xd   : > { %v278_v1 = vsel %vm276_vm0, %v1515_v0, 0  ;;  %v1569_v3 = vld [vmem:[%s2164_s1 + $0x6] sm:$0x3]  ;;  %v531_v4 = vsel %vm276_vm0, %v1556_v2, 0  ;;  %v231_v6 = vld [vmem:[%s2164_s1] sm:$0x3] }
   0xe   : > { %1745 = vmatpush.bf16.msra.mxu1 %v278_v1  ;;  %1746 = vmatpush.bf16.msra.mxu2 %v278_v1  ;;  %v614_v5 = vsel %vm276_vm0, %v1569_v3, 0  ;;  %v342_v7 = vsel %vm276_vm0, %v231_v6, 0  ;;  %v1598_v8 = vld [vmem:[%s2164_s1 + $0x8] sm:$0x3]  ;;  %s1748_s26 = smul.u32 288, %s2174_s12  ;;  %vm263_vm1 = vcmask 31744  }
   0xf   : > { %1747 = vmatpush.bf16.msra.mxu3 %v278_v1  ;;  %287 = vmatpush.bf16.msra.mxu0 %v278_v1  ;;  %v697_v9 = vsel %vm276_vm0, %v1598_v8, 0  ;;  %v1648_v10 = vld [vmem:[%s2164_s1 + $0xc] sm:$0x3]  ;;  %v1677_v11 = vld [vmem:[%s2164_s1 + $0xe] sm:$0x3]  ;;  %vm1290_vm5 = vcmask 64512  }
  0x10   : > { %s1862_s29 = scalar_lea.vmem %s2163_s0, %s1748_s26  ;;  %v1635_v12 = vld [vmem:[%s2164_s1 + $0xa] sm:$0x3]  ;;  %v974_v24 = vsel %vm276_vm0, %v1648_v10, 0  ;;  %v1057_v28 = vsel %vm276_vm0, %v1677_v11, 0  ;;  %v1714_v38 = vld [vmem:[%s2164_s1 + $0x10] sm:$0x3] }
  0x11   : > { %v1522_v13 = vld [vmem:[%s1862_s29 + $0x58] sm:$0xf]  ;;  %v1726_v14 = vld [vmem:[%s1862_s29 + $0x5c] sm:$0xf0]  ;;  %v1526_v15 = vld [vmem:[%s1862_s29 + $0x68] sm:$0xf] }
  0x12   : > { %540 = vmatpush.bf16.msrb.mxu2 %v531_v4  ;;  %351 = vmatpush.bf16.msrb.mxu1 %v342_v7  ;;  %v1523_v16 = vor.u32 %v1726_v14, %v1522_v13  ;;  %v1727_v17 = vld [vmem:[%s1862_s29 + $0x6c] sm:$0xf0]  ;;  %v1530_v18 = vld [vmem:[%s1862_s29 + $0x78] sm:$0xf]  ;;  %v1728_v19 = vld [vmem:[%s1862_s29 + $0x7c] sm:$0xf0] }
  0x13   : > { %623 = vmatpush.bf16.msrb.mxu3 %v614_v5  ;;  %706 = vmatpush.bf16.msrb.mxu0 %v697_v9  ;;  %v1527_v20 = vor.u32 %v1727_v17, %v1526_v15  ;;  %v1531_v21 = vor.u32 %v1728_v19, %v1530_v18  ;;  %v1518_v22 = vld [vmem:[%s1862_s29 + $0x48] sm:$0xf]  ;;  %v1725_v23 = vld [vmem:[%s1862_s29 + $0x4c] sm:$0xf0]  ;;  %v373_v26 = vld [vmem:[%s1862_s29] sm:$0xf] }
  0x14   : > { %1533 = vmatmul.msk.bf16.vlgmr.msra.gmra.mxu1 %vm263_vm1, %v1523_v16  ;;  %v1519_v25 = vor.u32 %v1725_v23, %v1518_v22  ;;  %v374_v27 = vld [vmem:[%s1862_s29 + $0x4] sm:$0x1]  ;;  %v891_v29 = vsel %vm276_vm0, %v1635_v12, 0  ;;  %v375_v30 = vld [vmem:[%s1862_s29 + $0x8] sm:$0xf]  ;;  %v393_v32 = vshrl.u32 %v373_v26, 16 }
  0x15   : > { %1534 = vmatmul.msk.bf16.vlgmr.msra.gmra.mxu2 %vm263_vm1, %v1527_v20  ;;  %1535 = vmatmul.msk.bf16.vlgmr.msra.gmra.mxu3 %vm263_vm1, %v1531_v21  ;;  %v376_v31 = vld [vmem:[%s1862_s29 + $0xc] sm:$0x1]  ;;  %v396_v33 = vshll.u32 %v373_v26, 16  ;;  %v402_v34 = vshll.u32 %v374_v27, 16  ;;  %v407_v35 = vshrl.u32 %v375_v30, 16  ;;  %v410_v36 = vshll.u32 %v375_v30, 16 }
  0x16   : > { %1532 = vmatmul.msk.bf16.vlgmr.msra.gmra.mxu0 %vm263_vm1, %v1519_v25  ;;  %v416_v37 = vshll.u32 %v376_v31, 16  ;;  %983 = vmatpush.bf16.msra.mxu2 %v974_v24  ;;  %vm389_vm2 = vsmask.f32 3328  ;;  %vm390_vm3 = vsmask.f32 7440  ;;  %v395_v39 = vrot.slane %v393_v32, 4 }
  0x17   : > { %v398_v40 = vrot.slane %v396_v33, 5  ;;  %1066 = vmatpush.bf16.msra.mxu3 %v1057_v28  ;;  %900 = vmatpush.bf16.msra.mxu1 %v891_v29  ;;  %v409_v41 = vrot.slane %v407_v35, 4  ;;  %v412_v42 = vrot.slane %v410_v36, 5  ;;  %v404_v44 = vrot.slane %v402_v34, 5  ;;  %vm1896_vm4 = vmor %vm389_vm2, %vm390_vm3  ;;  %v377_v49 = vld [vmem:[%s1862_s29 + $0x10] sm:$0xf] }
  0x18   : > { %v1251_v45 = vsel %vm276_vm0, %v1714_v38, 0  ;;  %v418_v48 = vrot.slane %v416_v37, 5  ;;  %v379_v50 = vld [vmem:[%s1862_s29 + $0x18] sm:$0xf]  ;;  %v1538_v51 = vld [vmem:[%s1862_s29] sm:$0xf] }
  0x19   : > { %v399_v43 = vor.u32 %v398_v40, %v395_v39  ;;  %v413_v47 = vor.u32 %v412_v42, %v409_v41  ;;  %1260 = vmatpush.bf16.msra.mxu0 %v1251_v45  ;;  %v421_v53 = vshrl.u32 %v377_v49, 16  ;;  %v424_v54 = vshll.u32 %v377_v49, 16  ;;  %v1721_v55 = vld [vmem:[%s1862_s29 + $0x4] sm:$0xf0]  ;;  %v1572_v60 = vld [vmem:[%s1862_s29 + $0x90] sm:$0xf] }
  0x1a   : > { %v435_v57 = vshrl.u32 %v379_v50, 16  ;;  %v438_v58 = vshll.u32 %v379_v50, 16  ;;  %v1729_v61 = vld [vmem:[%s1862_s29 + $0x94] sm:$0xf0]  ;;  %v1733_v3 = vld [vmem:[%s1862_s29 + $0xdc] sm:$0xf0]  ;;  %v1539_v9 = vor.u32 %v1721_v55, %v1538_v51 }
  0x1b   : > { %v400_v52 = vrot.slane %v399_v43, 4  ;;  %v414_v56 = vrot.slane %v413_v47, 4  ;;  %v423_v62 = vrot.slane %v421_v53, 4  ;;  %v426_v63 = vrot.slane %v424_v54, 5  ;;  %v1601_v2 = vld [vmem:[%s1862_s29 + $0xd8] sm:$0xf] }
  0x1c   : > { %v437_v4 = vrot.slane %v435_v57, 4  ;;  %v440_v5 = vrot.slane %v438_v58, 5  ;;  %v378_v7 = vld [vmem:[%s1862_s29 + $0x14] sm:$0x1]  ;;  %v380_v8 = vld [vmem:[%s1862_s29 + $0x1c] sm:$0x1]  ;;  %v1573_v11 = vor.u32 %v1729_v61, %v1572_v60  ;;  %v1602_v12 = vor.u32 %v1733_v3, %v1601_v2 }
  0x1d   : > { %v405_v59 = vsel %vm1896_vm4, %v400_v52, %v404_v44  ;;  %v419_v0 = vsel %vm1896_vm4, %v414_v56, %v418_v48  ;;  %v427_v13 = vor.u32 %v426_v63, %v423_v62  ;;  %v430_v14 = vshll.u32 %v378_v7, 16  ;;  %v381_v21 = vld [vmem:[%s1862_s29 + $0x20] sm:$0xf]  ;;  %v383_v22 = vld [vmem:[%s1862_s29 + $0x28] sm:$0xf]  ;;  %s1506_s11 = sshll.u32 %s2174_s12, 1 }
  0x1e   : > { %v506_v1 = vunpack.c.l.b16 %v405_v59  ;;  %v507_v6 = vunpack.c.l.b16 %v419_v0  ;;  %v441_v15 = vor.u32 %v440_v5, %v437_v4  ;;  %v444_v16 = vshll.u32 %v380_v8, 16  ;;  %v1542_v29 = vld [vmem:[%s1862_s29 + $0x10] sm:$0xf]  ;;  %v1722_v30 = vld [vmem:[%s1862_s29 + $0x14] sm:$0xf0]  ;;  %s221_s18 = scalar_lea.vmem %s2166_s3, %s1506_s11  ;;  %s1505_s19 = sshll.u32 %s2174_s12, 3 }
  0x1f   : > { %v428_v17 = vrot.slane %v427_v13, 4  ;;  %v432_v18 = vrot.slane %v430_v14, 5  ;;  %v449_v23 = vshrl.u32 %v381_v21, 16  ;;  %v452_v24 = vshll.u32 %v381_v21, 16  ;;  %v1576_v33 = vld [vmem:[%s1862_s29 + $0xa0] sm:$0xf]  ;;  %s214_s22 = scalar_lea.vmem %s2165_s2, %s1505_s19 }
  0x20   : > { %v514_v10 = vpack.c.b16 %v507_v6, %v506_v1  ;;  %v442_v19 = vrot.slane %v441_v15, 4  ;;  %v446_v20 = vrot.slane %v444_v16, 5  ;;  %v463_v27 = vshrl.u32 %v383_v22, 16  ;;  %v1730_v34 = vld [vmem:[%s1862_s29 + $0xa4] sm:$0xf0] }
  0x21   : > { %v433_v25 = vsel %vm1896_vm4, %v428_v17, %v432_v18  ;;  %v466_v28 = vshll.u32 %v383_v22, 16  ;;  %v1605_v35 = vld [vmem:[%s1862_s29 + $0xe8] sm:$0xf]  ;;  %v1734_v36 = vld [vmem:[%s1862_s29 + $0xec] sm:$0xf0]  ;;  %v451_v37 = vrot.slane %v449_v23, 4  ;;  %v1543_v43 = vor.u32 %v1722_v30, %v1542_v29 }
  0x22   : > { %v447_v26 = vsel %vm1896_vm4, %v442_v19, %v446_v20  ;;  %v508_v31 = vunpack.c.l.b16 %v433_v25  ;;  %v454_v38 = vrot.slane %v452_v24, 5  ;;  %v465_v39 = vrot.slane %v463_v27, 4  ;;  %v382_v41 = vld [vmem:[%s1862_s29 + $0x24] sm:$0x1]  ;;  %v384_v42 = vld [vmem:[%s1862_s29 + $0x2c] sm:$0x1] }
  0x23   : > { %v509_v32 = vunpack.c.l.b16 %v447_v26  ;;  %v468_v40 = vrot.slane %v466_v28, 5  ;;  %v1577_v45 = vor.u32 %v1730_v34, %v1576_v33  ;;  %v1606_v47 = vor.u32 %v1734_v36, %v1605_v35  ;;  %v385_v52 = vld [vmem:[%s1862_s29 + $0x30] sm:$0xf]  ;;  %v387_v53 = vld [vmem:[%s1862_s29 + $0x38] sm:$0xf] }
  0x24   : > { %1552 = vmatmul.msk.bf16.vlgmr.msrb.gmra.mxu1 %vm263_vm1, %v1539_v9  ;;  %v455_v48 = vor.u32 %v454_v38, %v451_v37  ;;  %v458_v49 = vshll.u32 %v382_v41, 16  ;;  %v472_v51 = vshll.u32 %v384_v42, 16  ;;  %v477_v58 = vshrl.u32 %v385_v52, 16  ;;  %v386_v4 = vld [vmem:[%s1862_s29 + $0x34] sm:$0x1] }
  0x25   : > { %1557 = vmatmul.msk.bf16.vlgmr.msrb.gmra.mxu2 %vm263_vm1, %v514_v10  ;;  %1586 = vmatmul.msk.bf16.vlgmr.msrb.gmra.mxu3 %vm263_vm1, %v1573_v11  ;;  %v515_v44 = vpack.c.b16 %v509_v32, %v508_v31  ;;  %v469_v50 = vor.u32 %v468_v40, %v465_v39  ;;  %v480_v59 = vshll.u32 %v385_v52, 16  ;;  %v491_v60 = vshrl.u32 %v387_v53, 16  ;;  %v388_v5 = vld [vmem:[%s1862_s29 + $0x3c] sm:$0x1]  ;;  %v1546_v6 = vld [vmem:[%s1862_s29 + $0x20] sm:$0xf] }
  0x26   : > { %1615 = vmatmul.msk.bf16.vlgmr.msrb.gmra.mxu0 %vm263_vm1, %v1602_v12  ;;  %v456_v54 = vrot.slane %v455_v48, 4  ;;  %v460_v55 = vrot.slane %v458_v49, 5  ;;  %v474_v57 = vrot.slane %v472_v51, 5  ;;  %v494_v61 = vshll.u32 %v387_v53, 16  ;;  %v1723_v7 = vld [vmem:[%s1862_s29 + $0x24] sm:$0xf0] }
  0x27   : > { %v470_v56 = vrot.slane %v469_v50, 4  ;;  %v479_v0 = vrot.slane %v477_v58, 4  ;;  %v482_v1 = vrot.slane %v480_v59, 5  ;;  %v493_v2 = vrot.slane %v491_v60, 4  ;;  %v1580_v10 = vld [vmem:[%s1862_s29 + $0xb0] sm:$0xf] }
  0x28   : > { %v461_v62 = vsel %vm1896_vm4, %v456_v54, %v460_v55  ;;  %v496_v3 = vrot.slane %v494_v61, 5  ;;  %v1731_v11 = vld [vmem:[%s1862_s29 + $0xb4] sm:$0xf0]  ;;  %v1735_v13 = vld [vmem:[%s1862_s29 + $0xfc] sm:$0xf0]  ;;  %v486_v15 = vshll.u32 %v386_v4, 16  ;;  %v1547_v18 = vor.u32 %v1723_v7, %v1546_v6 }
  0x29   : > { %v475_v63 = vsel %vm1896_vm4, %v470_v56, %v474_v57  ;;  %v510_v8 = vunpack.c.l.b16 %v461_v62  ;;  %v1609_v12 = vld [vmem:[%s1862_s29 + $0xf8] sm:$0xf]  ;;  %v483_v14 = vor.u32 %v482_v1, %v479_v0  ;;  %v500_v17 = vshll.u32 %v388_v5, 16  ;;  %v1619_v26 = vld [vmem:[%s1862_s29 + $0x90] sm:$0xf] }
  0x2a   : > { %v511_v9 = vunpack.c.l.b16 %v475_v63  ;;  %v497_v16 = vor.u32 %v496_v3, %v493_v2  ;;  %v1581_v20 = vor.u32 %v1731_v11, %v1580_v10  ;;  %v1610_v21 = vor.u32 %v1735_v13, %v1609_v12  ;;  %v1621_v27 = vld [vmem:[%s1862_s29 + $0x98] sm:$0xf]  ;;  %v1698_v28 = vld [vmem:[%s1862_s29 + $0x8] sm:$0xf]  ;;  %v1700_v29 = vld [vmem:[%s1862_s29 + $0x10] sm:$0xf] }
  0x2b   : > { %v484_v22 = vrot.slane %v483_v14, 4  ;;  %v488_v23 = vrot.slane %v486_v15, 5  ;;  %v502_v25 = vrot.slane %v500_v17, 5  ;;  %v753_v32 = vshrl.u32 %v1619_v26, 16  ;;  %v1550_v40 = vld [vmem:[%s1862_s29 + $0x30] sm:$0xf] }
  0x2c   : > { %v516_v19 = vpack.c.b16 %v511_v9, %v510_v8  ;;  %v498_v24 = vrot.slane %v497_v16, 4  ;;  %v756_v33 = vshll.u32 %v1619_v26, 16  ;;  %v767_v34 = vshrl.u32 %v1621_v27, 16  ;;  %v1724_v41 = vld [vmem:[%s1862_s29 + $0x34] sm:$0xf0] }
  0x2d   : > { %v489_v30 = vsel %vm1896_vm4, %v484_v22, %v488_v23  ;;  %v770_v35 = vshll.u32 %v1621_v27, 16  ;;  %v1113_v36 = vshrl.u32 %v1698_v28, 16  ;;  %v1116_v37 = vshll.u32 %v1698_v28, 16  ;;  %v1622_v52 = vld [vmem:[%s1862_s29 + $0x9c] sm:$0x1] }
  0x2e   : > { %v503_v31 = vsel %vm1896_vm4, %v498_v24, %v502_v25  ;;  %v1127_v38 = vshrl.u32 %v1700_v29, 16  ;;  %v1130_v39 = vshll.u32 %v1700_v29, 16  ;;  %v512_v42 = vunpack.c.l.b16 %v489_v30  ;;  %v1699_v57 = vld [vmem:[%s1862_s29 + $0xc] sm:$0x1]  ;;  %v1701_v58 = vld [vmem:[%s1862_s29 + $0x14] sm:$0x1] }
  0x2f   : > { %v755_v48 = vrot.slane %v753_v32, 4  ;;  %v758_v49 = vrot.slane %v756_v33, 5  ;;  %v769_v50 = vrot.slane %v767_v34, 4  ;;  %v772_v51 = vrot.slane %v770_v35, 5  ;;  %v1613_v62 = vld [vmem:[%s1862_s29 + $0x108] sm:$0xf] }
  0x30   : > { %v1115_v53 = vrot.slane %v1113_v36, 4  ;;  %v1118_v54 = vrot.slane %v1116_v37, 5  ;;  %v1129_v55 = vrot.slane %v1127_v38, 4  ;;  %v1132_v56 = vrot.slane %v1130_v39, 5  ;;  %v1736_v63 = vld [vmem:[%s1862_s29 + $0x10c] sm:$0xf0] }
  0x31   : > { %v1551_v59 = vor.u32 %v1724_v41, %v1550_v40  ;;  %v759_v0 = vor.u32 %v758_v49, %v755_v48  ;;  %v773_v2 = vor.u32 %v772_v51, %v769_v50  ;;  %v776_v3 = vshll.u32 %v1622_v52, 16  ;;  %v1623_v9 = vld [vmem:[%s1862_s29 + $0xa0] sm:$0xf]  ;;  %v1625_v10 = vld [vmem:[%s1862_s29 + $0xa8] sm:$0xf] }
  0x32   : > { %v1119_v4 = vor.u32 %v1118_v54, %v1115_v53  ;;  %v1122_v5 = vshll.u32 %v1699_v57, 16  ;;  %v1133_v6 = vor.u32 %v1132_v56, %v1129_v55  ;;  %v1136_v7 = vshll.u32 %v1701_v58, 16  ;;  %v1702_v23 = vld [vmem:[%s1862_s29 + $0x18] sm:$0xf]  ;;  %v1704_v24 = vld [vmem:[%s1862_s29 + $0x20] sm:$0xf] }
  0x33   : > { %v1614_v8 = vor.u32 %v1736_v63, %v1613_v62  ;;  %v760_v11 = vrot.slane %v759_v0, 4  ;;  %v774_v13 = vrot.slane %v773_v2, 4  ;;  %v778_v14 = vrot.slane %v776_v3, 5  ;;  %v1624_v29 = vld [vmem:[%s1862_s29 + $0xa4] sm:$0x1] }
  0x34   : > { %1553 = vmatmul.msk.bf16.gmra.mxu1 %vm263_vm1, %v1543_v43  ;;  %v513_v43 = vunpack.c.l.b16 %v503_v31  ;;  %v1120_v15 = vrot.slane %v1119_v4, 4  ;;  %v1124_v16 = vrot.slane %v1122_v5, 5  ;;  %v1134_v17 = vrot.slane %v1133_v6, 4  ;;  %v1626_v34 = vld [vmem:[%s1862_s29 + $0xac] sm:$0x1] }
  0x35   : > { %1558 = vmatmul.msk.bf16.gmra.mxu2 %vm263_vm1, %v515_v44  ;;  %1587 = vmatmul.msk.bf16.gmra.mxu3 %vm263_vm1, %v1577_v45  ;;  %v1584_v44 = vld [vmem:[%s1862_s29 + $0xc0] sm:$0xf]  ;;  %v1732_v45 = vld [vmem:[%s1862_s29 + $0xc4] sm:$0xf0]  ;;  %v798_v22 = vshll.u32 %v1625_v10, 16  ;;  %v779_v26 = vsel %vm1896_vm4, %v774_v13, %v778_v14  ;;  %v1141_v35 = vshrl.u32 %v1702_v23, 16 }
  0x36   : > { %1616 = vmatmul.msk.bf16.gmra.mxu0 %vm263_vm1, %v1606_v47  ;;  %v1620_v47 = vld [vmem:[%s1862_s29 + $0x94] sm:$0x1]  ;;  %v517_v60 = vpack.c.b16 %v513_v43, %v512_v42  ;;  %v1585_v61 = vor.u32 %v1732_v45, %v1584_v44  ;;  %v1125_v27 = vsel %vm1896_vm4, %v1120_v15, %v1124_v16  ;;  %v1144_v36 = vshll.u32 %v1702_v23, 16  ;;  %v1651_v41 = vld [vmem:[%s1862_s29 + $0x8] sm:$0xf] }
  0x37   : > { %v762_v1 = vshll.u32 %v1620_v47, 16  ;;  %v800_v33 = vrot.slane %v798_v22, 5  ;;  %v1155_v37 = vshrl.u32 %v1704_v24, 16  ;;  %v1158_v38 = vshll.u32 %v1704_v24, 16  ;;  %v1737_v42 = vld [vmem:[%s1862_s29 + $0xc] sm:$0xf0] }
  0x38   : > { %v867_v40 = vunpack.c.l.b16 %v779_v26  ;;  %v1226_v43 = vunpack.c.l.b16 %v1125_v27  ;;  %v1680_v45 = vld [vmem:[%s1862_s29 + $0x50] sm:$0xf]  ;;  %v1741_v47 = vld [vmem:[%s1862_s29 + $0x54] sm:$0xf0]  ;;  %v790_v49 = vshll.u32 %v1624_v29, 16  ;;  %v804_v51 = vshll.u32 %v1626_v34, 16 }
  0x39   : > { %v764_v12 = vrot.slane %v762_v1, 5  ;;  %v1143_v52 = vrot.slane %v1141_v35, 4  ;;  %v1146_v53 = vrot.slane %v1144_v36, 5  ;;  %v1157_v54 = vrot.slane %v1155_v37, 4  ;;  %v1703_v57 = vld [vmem:[%s1862_s29 + $0x1c] sm:$0x1] }
  0x3a   : > { %v1160_v55 = vrot.slane %v1158_v38, 5  ;;  %v1705_v58 = vld [vmem:[%s1862_s29 + $0x24] sm:$0x1]  ;;  %v792_v63 = vrot.slane %v790_v49, 5  ;;  %v806_v1 = vrot.slane %v804_v51, 5  ;;  %v1150_v3 = vshll.u32 %v1703_v57, 16 }
  0x3b   : > { %v765_v25 = vsel %vm1896_vm4, %v760_v11, %v764_v12  ;;  %v1147_v2 = vor.u32 %v1146_v53, %v1143_v52  ;;  %v1164_v5 = vshll.u32 %v1705_v58, 16  ;;  %v1627_v6 = vld [vmem:[%s1862_s29 + $0xb0] sm:$0xf]  ;;  %v1738_v29 = vld [vmem:[%s1862_s29 + $0x1c] sm:$0xf0]  ;;  %vm1312_vm6 = vcmask 57344  }
  0x3c   : > { %v866_v39 = vunpack.c.l.b16 %v765_v25  ;;  %v1161_v4 = vor.u32 %v1160_v55, %v1157_v54  ;;  %v1152_v12 = vrot.slane %v1150_v3, 5  ;;  %v1708_v15 = vld [vmem:[%s1862_s29 + $0x30] sm:$0xf]  ;;  %v809_v16 = vshrl.u32 %v1627_v6, 16  ;;  %v1628_v35 = vld [vmem:[%s1862_s29 + $0xb4] sm:$0x1] }
  0x3d   : > { %v1148_v11 = vrot.slane %v1147_v2, 4  ;;  %v1166_v14 = vrot.slane %v1164_v5, 5  ;;  %v1183_v22 = vshrl.u32 %v1708_v15, 16  ;;  %v1186_v23 = vshll.u32 %v1708_v15, 16  ;;  %v1630_v36 = vld [vmem:[%s1862_s29 + $0xbc] sm:$0x1] }
  0x3e   : > { %v874_v56 = vpack.c.b16 %v867_v40, %v866_v39  ;;  %v1162_v13 = vrot.slane %v1161_v4, 4  ;;  %v1742_v39 = vld [vmem:[%s1862_s29 + $0x64] sm:$0xf0]  ;;  %v818_v49 = vshll.u32 %v1628_v35, 16  ;;  %v832_v51 = vshll.u32 %v1630_v36, 16 }
  0x3f   : > { %v1153_v26 = vsel %vm1896_vm4, %v1148_v11, %v1152_v12  ;;  %v1631_v3 = vld [vmem:[%s1862_s29 + $0xc0] sm:$0xf]  ;;  %v1633_v4 = vld [vmem:[%s1862_s29 + $0xc8] sm:$0xf]  ;;  %vm1376_vm7 = vcmask 523264  }
  0x40   : > { %v1167_v27 = vsel %vm1896_vm4, %v1162_v13, %v1166_v14  ;;  %v1228_v40 = vunpack.c.l.b16 %v1153_v26  ;;  %v851_v11 = vshrl.u32 %v1633_v4, 16  ;;  %v854_v12 = vshll.u32 %v1633_v4, 16  ;;  %v1692_v4 = vld [vmem:[%s1862_s29 + $0x80] sm:$0xf] }
  0x44   : > { %1554 = vmatmul.msk.bf16.gmra.mxu1 %vm263_vm1, %v1547_v18  ;;  %v1138_v18 = vrot.slane %v1136_v7, 5  ;;  %v1629_v7 = vld [vmem:[%s1862_s29 + $0xb8] sm:$0xf] }
  0x45   : > { %1559 = vmatmul.msk.bf16.gmra.mxu2 %vm263_vm1, %v516_v19  ;;  %1588 = vmatmul.msk.bf16.gmra.mxu3 %vm263_vm1, %v1581_v20  ;;  %v781_v19 = vshrl.u32 %v1623_v9, 16  ;;  %v784_v20 = vshll.u32 %v1623_v9, 16 }
  0x46   : > { %1617 = vmatmul.msk.bf16.gmra.mxu0 %vm263_vm1, %v1610_v21  ;;  %v795_v21 = vshrl.u32 %v1625_v10, 16  ;;  %v1139_v28 = vsel %vm1896_vm4, %v1134_v17, %v1138_v18  ;;  %v1706_v10 = vld [vmem:[%s1862_s29 + $0x28] sm:$0xf]  ;;  %v812_v17 = vshll.u32 %v1627_v6, 16  ;;  %v823_v18 = vshrl.u32 %v1629_v7, 16 }
  0x47   : > { %v783_v30 = vrot.slane %v781_v19, 4  ;;  %v786_v31 = vrot.slane %v784_v20, 5  ;;  %v1227_v44 = vunpack.c.l.b16 %v1139_v28  ;;  %v826_v19 = vshll.u32 %v1629_v7, 16  ;;  %v1655_v28 = vld [vmem:[%s1862_s29 + $0x18] sm:$0xf] }
  0x48   : > { %v797_v32 = vrot.slane %v795_v21, 4  ;;  %v1169_v20 = vshrl.u32 %v1706_v10, 16  ;;  %v1172_v21 = vshll.u32 %v1706_v10, 16  ;;  %v1656_v52 = vor.u32 %v1738_v29, %v1655_v28  ;;  %v1710_v7 = vld [vmem:[%s1862_s29 + $0x38] sm:$0xf] }
  0x49   : > { %v787_v48 = vor.u32 %v786_v31, %v783_v30  ;;  %v1684_v30 = vld [vmem:[%s1862_s29 + $0x60] sm:$0xf]  ;;  %v811_v31 = vrot.slane %v809_v16, 4  ;;  %v828_v34 = vrot.slane %v826_v19, 5  ;;  %v840_v10 = vshll.u32 %v1631_v3, 16 }
  0x4a   : > { %v801_v50 = vor.u32 %v800_v33, %v797_v32  ;;  %v814_v32 = vrot.slane %v812_v17, 5  ;;  %v825_v33 = vrot.slane %v823_v18, 4  ;;  %v1171_v37 = vrot.slane %v1169_v20, 4 }
  0x4b   : > { %v788_v62 = vrot.slane %v787_v48, 4  ;;  %v1174_v38 = vrot.slane %v1172_v21, 5  ;;  %v1685_v53 = vor.u32 %v1742_v39, %v1684_v30  ;;  %v1197_v15 = vshrl.u32 %v1710_v7, 16  ;;  %v1659_v21 = vld [vmem:[%s1862_s29 + $0x28] sm:$0xf] }
  0x4c   : > { %v802_v0 = vrot.slane %v801_v50, 4  ;;  %v815_v48 = vor.u32 %v814_v32, %v811_v31  ;;  %v829_v50 = vor.u32 %v828_v34, %v825_v33  ;;  %v1200_v16 = vshll.u32 %v1710_v7, 16  ;;  %v1632_v31 = vld [vmem:[%s1862_s29 + $0xc4] sm:$0x1]  ;;  %v1634_v32 = vld [vmem:[%s1862_s29 + $0xcc] sm:$0x1] }
  0x4d   : > { %v1175_v54 = vor.u32 %v1174_v38, %v1171_v37  ;;  %v842_v26 = vrot.slane %v840_v10, 5  ;;  %v856_v28 = vrot.slane %v854_v12, 5  ;;  %v1199_v33 = vrot.slane %v1197_v15, 4 }
  0x4e   : > { %v807_v9 = vsel %vm1896_vm4, %v802_v0, %v806_v1  ;;  %v1202_v34 = vrot.slane %v1200_v16, 5 }
  0x4f   : > { %v869_v25 = vunpack.c.l.b16 %v807_v9  ;;  %v837_v9 = vshrl.u32 %v1631_v3, 16  ;;  %v1740_v3 = vld [vmem:[%s1862_s29 + $0x3c] sm:$0xf0] }
  0x54   : > { %1555 = vmatmul.msk.bf16.gmra.mxu1 %vm263_vm1, %v1551_v59  ;;  %v1652_v59 = vor.u32 %v1737_v42, %v1651_v41  ;;  %v1229_v41 = vunpack.c.l.b16 %v1167_v27  ;;  %v1707_v42 = vld [vmem:[%s1862_s29 + $0x2c] sm:$0x1]  ;;  %v853_v27 = vrot.slane %v851_v11, 4 }
  0x55   : > { %1560 = vmatmul.msk.bf16.gmra.mxu2 %vm263_vm1, %v517_v60  ;;  %1589 = vmatmul.msk.bf16.gmra.mxu3 %vm263_vm1, %v1585_v61  ;;  %v1681_v60 = vor.u32 %v1741_v47, %v1680_v45  ;;  %v1234_v61 = vpack.c.b16 %v1227_v44, %v1226_v43  ;;  %v1185_v43 = vrot.slane %v1183_v22, 4  ;;  %v1188_v44 = vrot.slane %v1186_v23, 5  ;;  %v1709_v47 = vld [vmem:[%s1862_s29 + $0x34] sm:$0x1]  ;;  %v1739_v22 = vld [vmem:[%s1862_s29 + $0x2c] sm:$0xf0] }
  0x56   : > { %1618 = vmatmul.msk.bf16.gmra.mxu0 %vm263_vm1, %v1614_v8  ;;  %v793_v8 = vsel %vm1896_vm4, %v788_v62, %v792_v63  ;;  %v1178_v55 = vshll.u32 %v1707_v42, 16  ;;  %v1192_v58 = vshll.u32 %v1709_v47, 16  ;;  %v834_v62 = vrot.slane %v832_v51, 5  ;;  %v1688_v23 = vld [vmem:[%s1862_s29 + $0x70] sm:$0xf] }
  0x57   : > { %v868_v24 = vunpack.c.l.b16 %v793_v8  ;;  %v1189_v57 = vor.u32 %v1188_v44, %v1185_v43  ;;  %v1176_v63 = vrot.slane %v1175_v54, 4  ;;  %v1712_v8 = vld [vmem:[%s1862_s29 + $0x40] sm:$0xf]  ;;  %v1660_v38 = vor.u32 %v1739_v22, %v1659_v21 }
  0x58   : > { %v1180_v0 = vrot.slane %v1178_v55, 5  ;;  %v1194_v2 = vrot.slane %v1192_v58, 5  ;;  %v1211_v17 = vshrl.u32 %v1712_v8, 16  ;;  %v1214_v18 = vshll.u32 %v1712_v8, 16 }
  0x59   : > { %v875_v45 = vpack.c.b16 %v869_v25, %v868_v24  ;;  %v1190_v1 = vrot.slane %v1189_v57, 4  ;;  %v1743_v24 = vld [vmem:[%s1862_s29 + $0x74] sm:$0xf0]  ;;  %v839_v25 = vrot.slane %v837_v9, 4  ;;  %v846_v43 = vshll.u32 %v1632_v31, 16 }
  0x5a   : > { %v1181_v13 = vsel %vm1896_vm4, %v1176_v63, %v1180_v0  ;;  %v1213_v35 = vrot.slane %v1211_v17, 4  ;;  %v1216_v36 = vrot.slane %v1214_v18, 5  ;;  %v1689_v39 = vor.u32 %v1743_v24, %v1688_v23 }
  0x5b   : > { %v1195_v14 = vsel %vm1896_vm4, %v1190_v1, %v1194_v2  ;;  %v1230_v29 = vunpack.c.l.b16 %v1181_v13  ;;  %v843_v42 = vor.u32 %v842_v26, %v839_v25  ;;  %v857_v44 = vor.u32 %v856_v28, %v853_v27  ;;  %v1663_v2 = vld [vmem:[%s1862_s29 + $0x38] sm:$0xf] }
  0x5c   : > { %v1231_v30 = vunpack.c.l.b16 %v1195_v14  ;;  %v1664_v10 = vor.u32 %v1740_v3, %v1663_v2 }
  0x5d   : > { %v858_v54 = vrot.slane %v857_v44, 4 }
  0x5e   : > { %v1236_v47 = vpack.c.b16 %v1231_v30, %v1230_v29 }
  0x64   : > { %1636 = vmatmul.msk.bf16.vlgmr.msra.gmra.mxu1 %vm263_vm1, %v874_v56  ;;  %v1235_v56 = vpack.c.b16 %v1229_v41, %v1228_v40  ;;  %v1711_v40 = vld [vmem:[%s1862_s29 + $0x3c] sm:$0x1]  ;;  %v1713_v41 = vld [vmem:[%s1862_s29 + $0x44] sm:$0x1] }
  0x65   : > { %1665 = vmatmul.msk.bf16.vlgmr.msra.gmra.mxu2 %vm263_vm1, %v1652_v59  ;;  %1694 = vmatmul.msk.bf16.vlgmr.msra.gmra.mxu3 %vm263_vm1, %v1681_v60  ;;  %v816_v59 = vrot.slane %v815_v48, 4  ;;  %v820_v60 = vrot.slane %v818_v49, 5  ;;  %v1203_v48 = vor.u32 %v1202_v34, %v1199_v33  ;;  %v1206_v49 = vshll.u32 %v1711_v40, 16 }
  0x66   : > { %1715 = vmatmul.msk.bf16.vlgmr.msra.gmra.mxu0 %vm263_vm1, %v1234_v61  ;;  %v830_v61 = vrot.slane %v829_v50, 4  ;;  %v1217_v50 = vor.u32 %v1216_v36, %v1213_v35  ;;  %v1220_v51 = vshll.u32 %v1713_v41, 16 }
  0x67   : > { %v821_v5 = vsel %vm1896_vm4, %v816_v59, %v820_v60  ;;  %v1208_v57 = vrot.slane %v1206_v49, 5 }
  0x68   : > { %v835_v6 = vsel %vm1896_vm4, %v830_v61, %v834_v62  ;;  %v870_v19 = vunpack.c.l.b16 %v821_v5  ;;  %v1218_v58 = vrot.slane %v1217_v50, 4  ;;  %v1222_v59 = vrot.slane %v1220_v51, 5  ;;  %v1744_v5 = vld [vmem:[%s1862_s29 + $0x84] sm:$0xf0] }
  0x69   : > { %v871_v20 = vunpack.c.l.b16 %v835_v6  ;;  %v1693_v11 = vor.u32 %v1744_v5, %v1692_v4 }
  0x6a   : > { %v1223_v63 = vsel %vm1896_vm4, %v1218_v58, %v1222_v59 }
  0x6b   : > { %v876_v37 = vpack.c.b16 %v871_v20, %v870_v19  ;;  %v1233_v7 = vunpack.c.l.b16 %v1223_v63 }
  0x74   : > { %1637 = vmatmul.msk.bf16.gmra.mxu1 %vm263_vm1, %v875_v45  ;;  %v860_v45 = vshll.u32 %v1634_v32, 16 }
  0x75   : > { %1666 = vmatmul.msk.bf16.gmra.mxu2 %vm263_vm1, %v1656_v52  ;;  %1695 = vmatmul.msk.bf16.gmra.mxu3 %vm263_vm1, %v1685_v53  ;;  %v844_v52 = vrot.slane %v843_v42, 4  ;;  %v848_v53 = vrot.slane %v846_v43, 5 }
  0x76   : > { %1716 = vmatmul.msk.bf16.gmra.mxu0 %vm263_vm1, %v1235_v56  ;;  %v862_v55 = vrot.slane %v860_v45, 5  ;;  %v1204_v56 = vrot.slane %v1203_v48, 4 }
  0x77   : > { %v849_v60 = vsel %vm1896_vm4, %v844_v52, %v848_v53 }
  0x78   : > { %v863_v61 = vsel %vm1896_vm4, %v858_v54, %v862_v55  ;;  %v1209_v62 = vsel %vm1896_vm4, %v1204_v56, %v1208_v57  ;;  %v872_v0 = vunpack.c.l.b16 %v849_v60 }
  0x79   : > { %v873_v1 = vunpack.c.l.b16 %v863_v61  ;;  %v1232_v6 = vunpack.c.l.b16 %v1209_v62 }
  0x7b   : > { %v877_v8 = vpack.c.b16 %v873_v1, %v872_v0  ;;  %v1237_v12 = vpack.c.b16 %v1233_v7, %v1232_v6 }
  0x84   : > { %1638 = vmatmul.msk.bf16.gmra.mxu1 %vm263_vm1, %v876_v37 }
  0x85   : > { %1667 = vmatmul.msk.bf16.gmra.mxu2 %vm263_vm1, %v1660_v38  ;;  %1696 = vmatmul.msk.bf16.gmra.mxu3 %vm263_vm1, %v1689_v39 }
  0x86   : > { %1717 = vmatmul.msk.bf16.gmra.mxu0 %vm263_vm1, %v1236_v47 }
  0x91   : > { %v294_v9 = vpop.f32.mrf.mxu1 }
  0x93   : > { %v289_v13 = vpop.f32.mrf.mxu0 }
  0x94   : > { %1639 = vmatmul.msk.bf16.gmra.mxu1 %vm263_vm1, %v877_v8 }
  0x95   : > { %1668 = vmatmul.msk.bf16.gmra.mxu2 %vm263_vm1, %v1664_v10  ;;  %1697 = vmatmul.msk.bf16.gmra.mxu3 %vm263_vm1, %v1693_v11 }
  0x96   : > { %1718 = vmatmul.msk.bf16.gmra.mxu0 %vm263_vm1, %v1237_v12 }
  0x98   : > { %v2064_v46 = vpop.f32.mrf.mxu2  ;;  %v2066_v14 = vpop.f32.mrf.mxu3 }
  0x99   : > { %v2068_v15 = vpop.f32.mrf.mxu1 }
  0x9b   : > { %v291_v16 = vpop.f32.mrf.mxu0 }
  0xa0   : > { %v2070_v17 = vpop.f32.mrf.mxu2  ;;  %v2072_v18 = vpop.f32.mrf.mxu3 }
  0xa1   : > { %v353_v19 = vpop.f32.mrf.mxu1 }
  0xa2   : > { %v354_v49 = vadd.f32 %v353_v19, %v289_v13 }
  0xa3   : > { %v708_v20 = vpop.f32.mrf.mxu0 }
  0xa8   : > { %v542_v21 = vpop.f32.mrf.mxu2  ;;  %v625_v22 = vpop.f32.mrf.mxu3 }
  0xa9   : > { %v355_v23 = vpop.f32.mrf.mxu1  ;;  %v562_v51 = vadd.f32 %v542_v21, %v354_v49 }
  0xaa   : > { %v356_v56 = vadd.f32 %v355_v23, %v291_v16 }
  0xab   : > { %v710_v24 = vpop.f32.mrf.mxu0  ;;  %v645_v54 = vadd.f32 %v625_v22, %v562_v51 }
  0xad   : > { %v728_v59 = vadd.f32 %v708_v20, %v645_v54 }
  0xb0   : > { %v544_v25 = vpop.f32.mrf.mxu2  ;;  %v627_v26 = vpop.f32.mrf.mxu3 }
  0xb1   : > { %v358_v27 = vpop.f32.mrf.mxu1  ;;  %v563_v58 = vadd.f32 %v544_v25, %v356_v56 }
  0xb2   : > { %v359_v2 = vadd.f32 %v358_v27, %v294_v9 }
  0xb3   : > { %v713_v28 = vpop.f32.mrf.mxu0  ;;  %v646_v63 = vadd.f32 %v627_v26, %v563_v58 }
  0xb5   : > { %v729_v7 = vadd.f32 %v710_v24, %v646_v63 }
  0xb8   : > { %v547_v29 = vpop.f32.mrf.mxu2  ;;  %v630_v30 = vpop.f32.mrf.mxu3 }
  0xb9   : > { %v360_v31 = vpop.f32.mrf.mxu1  ;;  %v564_v5 = vadd.f32 %v547_v29, %v359_v2 }
  0xba   : > { %v361_v19 = vadd.f32 %v360_v31, %v2068_v15 }
  0xbb   : > { %v2074_v32 = vpop.f32.mrf.mxu0  ;;  %v647_v12 = vadd.f32 %v630_v30, %v564_v5 }
  0xbd   : > { %v730_v25 = vadd.f32 %v713_v28, %v647_v12 }
  0xc0   : > { %v549_v33 = vpop.f32.mrf.mxu2  ;;  %v632_v34 = vpop.f32.mrf.mxu3 }
  0xc1   : > { %v2076_v35 = vpop.f32.mrf.mxu1  ;;  %v565_v22 = vadd.f32 %v549_v33, %v361_v19 }
  0xc2   : > { %v364_v28 = vadd.f32 %v2076_v35, %v2064_v46 }
  0xc3   : > { %v2078_v36 = vpop.f32.mrf.mxu0  ;;  %v648_v54 = vadd.f32 %v632_v34, %v565_v22 }
  0xc8   : > { %v2080_v37 = vpop.f32.mrf.mxu2  ;;  %v2082_v38 = vpop.f32.mrf.mxu3 }
  0xc9   : > { %v2084_v39 = vpop.f32.mrf.mxu1 }
  0xcb   : > { %v2086_v40 = vpop.f32.mrf.mxu0 }
  0xd0   : > { %v2088_v41 = vpop.f32.mrf.mxu2  ;;  %v2090_v42 = vpop.f32.mrf.mxu3 }
  0xd1   : > { %v2092_v43 = vpop.f32.mrf.mxu1 }
  0xd3   : > { %v2094_v44 = vpop.f32.mrf.mxu0 }
  0xd8   : > { %v2096_v45 = vpop.f32.mrf.mxu2  ;;  %v2098_v47 = vpop.f32.mrf.mxu3 }
  0xd9   : > { %v2100_v48 = vpop.f32.mrf.mxu1 }
  0xdb   : > { %v2102_v50 = vpop.f32.mrf.mxu0 }
  0xe0   : > { %v2104_v52 = vpop.f32.mrf.mxu2  ;;  %v2106_v53 = vpop.f32.mrf.mxu3 }
  0xe1   : > { %v902_v55 = vpop.f32.mrf.mxu1 }
  0xe2   : > { %v922_v60 = vadd.f32 %v902_v55, %v728_v59  ;;  %v566_v59 = vadd.f32 %v2080_v37, %v364_v28  ;;  %v366_v37 = vadd.f32 %v2084_v39, %v2070_v17 }
  0xe3   : > { %v1262_v57 = vpop.f32.mrf.mxu0 }
  0xe8   : > { %v985_v61 = vpop.f32.mrf.mxu2  ;;  %v1068_v62 = vpop.f32.mrf.mxu3 }
  0xe9   : > { %v1005_v0 = vadd.f32 %v985_v61, %v922_v60  ;;  %v904_v1 = vpop.f32.mrf.mxu1  ;;  %v731_v61 = vadd.f32 %v2074_v32, %v648_v54  ;;  %v567_v32 = vadd.f32 %v2088_v41, %v366_v37  ;;  %v369_v41 = vadd.f32 %v2092_v43, %v2066_v14 }
  0xea   : > { %v923_v8 = vadd.f32 %v904_v1, %v729_v7 }
  0xeb   : > { %v1088_v3 = vadd.f32 %v1068_v62, %v1005_v0  ;;  %v1264_v4 = vpop.f32.mrf.mxu0 }
  0xed   : > { %v1282_v6 = vadd.f32 %v1262_v57, %v1088_v3  ;;  %v649_v3 = vadd.f32 %v2082_v38, %v566_v59 }
  0xef   : > { %1344 = vxpose.xlu0.b32.start [1/8] (short) (narrow) %v1282_v6, 8  ;;  %v1314_v23 = vmul.f32 %v1282_v6, %v1282_v6  ;;  %v1291_v26 = vsel %vm1290_vm5, %v1282_v6, 0.0 }
  0xf0   : > { %v987_v10 = vpop.f32.mrf.mxu2  ;;  %v1070_v11 = vpop.f32.mrf.mxu3 }
  0xf1   : > { %v1006_v13 = vadd.f32 %v987_v10, %v923_v8  ;;  %v907_v16 = vpop.f32.mrf.mxu1  ;;  %v1322_v15 = vsel %vm1290_vm5, %v1314_v23, 0.0  ;;  %v732_v8 = vadd.f32 %v2078_v36, %v649_v3  ;;  %v568_v23 = vadd.f32 %v2096_v45, %v369_v41 }
  0xf2   : > { %v924_v29 = vadd.f32 %v907_v16, %v730_v25  ;;  %v371_v45 = vadd.f32 %v2100_v48, %v2072_v18 }
  0xf3   : > { %v1089_v20 = vadd.f32 %v1070_v11, %v1006_v13  ;;  %v1267_v21 = vpop.f32.mrf.mxu0 }
  0xf5   : > { %v1283_v9 = vadd.f32 %v1264_v4, %v1089_v20  ;;  %v650_v20 = vadd.f32 %v2090_v42, %v567_v32 }
  0xf7   : > { %v1292_v24 = vsel %vm1290_vm5, %v1283_v9, 0.0  ;;  %v1315_v27 = vmul.f32 %v1283_v9, %v1283_v9  ;;  %1345 = vxpose.xlu0.b32.cont [2/8] (short) (narrow) %v1283_v9, 8  ;;  %v733_v25 = vadd.f32 %v2086_v40, %v650_v20 }
  0xf8   : > { %v1293_v49 = vadd.f32 %v1292_v24, %v1291_v26  ;;  %v990_v30 = vpop.f32.mrf.mxu2  ;;  %v1073_v51 = vpop.f32.mrf.mxu3 }
  0xf9   : > { %v1323_v31 = vsel %vm1290_vm5, %v1315_v27, 0.0  ;;  %v1007_v55 = vadd.f32 %v990_v30, %v924_v29  ;;  %v909_v33 = vpop.f32.mrf.mxu1 }
  0xfa   : > { %v1324_v56 = vadd.f32 %v1323_v31, %v1322_v15  ;;  %v925_v63 = vadd.f32 %v909_v33, %v731_v61  ;;  %v569_v31 = vadd.f32 %v2104_v52, %v371_v45 }
  0xfb   : > { %v1090_v57 = vadd.f32 %v1073_v51, %v1007_v55  ;;  %v1269_v58 = vpop.f32.mrf.mxu0  ;;  %v651_v51 = vadd.f32 %v2098_v47, %v568_v23 }
  0xfd   : > { %v1284_v60 = vadd.f32 %v1267_v21, %v1090_v57  ;;  %v734_v33 = vadd.f32 %v2094_v44, %v651_v51 }
  0xff   : > { %v1294_v62 = vsel %vm1290_vm5, %v1284_v60, 0.0  ;;  %v1316_v34 = vmul.f32 %v1284_v60, %v1284_v60  ;;  %1346 = vxpose.xlu0.b32.cont [3/8] (short) (narrow) %v1284_v60, 8  ;;  %v652_v60 = vadd.f32 %v2106_v53, %v569_v31 }
 0x100   : > { %v1295_v0 = vadd.f32 %v1294_v62, %v1293_v49  ;;  %v992_v1 = vpop.f32.mrf.mxu2  ;;  %v1075_v2 = vpop.f32.mrf.mxu3 }
 0x101   : > { %v1325_v4 = vsel %vm1290_vm5, %v1316_v34, 0.0  ;;  %v1008_v46 = vadd.f32 %v992_v1, %v925_v63  ;;  %v912_v35 = vpop.f32.mrf.mxu1  ;;  %v735_v44 = vadd.f32 %v2102_v50, %v652_v60 }
 0x102   : > { %v1326_v5 = vadd.f32 %v1325_v4, %v1324_v56  ;;  %v926_v13 = vadd.f32 %v912_v35, %v732_v8 }
 0x103   : > { %v1091_v6 = vadd.f32 %v1075_v2, %v1008_v46  ;;  %v1272_v10 = vpop.f32.mrf.mxu0 }
 0x105   : > { %v1285_v7 = vadd.f32 %v1269_v58, %v1091_v6 }
 0x107   : > { %v1296_v11 = vsel %vm1290_vm5, %v1285_v7, 0.0  ;;  %v1317_v12 = vmul.f32 %v1285_v7, %v1285_v7  ;;  %1347 = vxpose.xlu0.b32.cont [4/8] (short) (narrow) %v1285_v7, 8 }
 0x108   : > { %v1297_v38 = vadd.f32 %v1296_v11, %v1295_v0  ;;  %v995_v16 = vpop.f32.mrf.mxu2  ;;  %v1078_v19 = vpop.f32.mrf.mxu3 }
 0x109   : > { %v1327_v21 = vsel %vm1290_vm5, %v1317_v12, 0.0  ;;  %v1009_v17 = vadd.f32 %v995_v16, %v926_v13  ;;  %v914_v39 = vpop.f32.mrf.mxu1 }
 0x10a   : > { %v1328_v22 = vadd.f32 %v1327_v21, %v1326_v5  ;;  %v927_v27 = vadd.f32 %v914_v39, %v733_v25 }
 0x10b   : > { %v1092_v36 = vadd.f32 %v1078_v19, %v1009_v17  ;;  %v1274_v29 = vpop.f32.mrf.mxu0 }
 0x10d   : > { %v1286_v9 = vadd.f32 %v1272_v10, %v1092_v36 }
 0x10f   : > { %v1298_v26 = vsel %vm1290_vm5, %v1286_v9, 0.0  ;;  %v1318_v24 = vmul.f32 %v1286_v9, %v1286_v9  ;;  %1348 = vxpose.xlu0.b32.cont [5/8] (short) (narrow) %v1286_v9, 8 }
 0x110   : > { %v1299_v42 = vadd.f32 %v1298_v26, %v1297_v38  ;;  %v997_v49 = vpop.f32.mrf.mxu2  ;;  %v1080_v30 = vpop.f32.mrf.mxu3 }
 0x111   : > { %v1329_v54 = vsel %vm1290_vm5, %v1318_v24, 0.0  ;;  %v1010_v14 = vadd.f32 %v997_v49, %v927_v27  ;;  %v917_v15 = vpop.f32.mrf.mxu1 }
 0x112   : > { %v1330_v43 = vadd.f32 %v1329_v54, %v1328_v22  ;;  %v928_v57 = vadd.f32 %v917_v15, %v734_v33 }
 0x113   : > { %v1093_v40 = vadd.f32 %v1080_v30, %v1010_v14  ;;  %v1277_v48 = vpop.f32.mrf.mxu0 }
 0x115   : > { %v1287_v55 = vadd.f32 %v1274_v29, %v1093_v40 }
 0x117   : > { %v1300_v56 = vsel %vm1290_vm5, %v1287_v55, 0.0  ;;  %v1319_v28 = vmul.f32 %v1287_v55, %v1287_v55  ;;  %1349 = vxpose.xlu0.b32.cont [6/8] (short) (narrow) %v1287_v55, 8 }
 0x118   : > { %v1301_v47 = vadd.f32 %v1300_v56, %v1299_v42  ;;  %v1000_v58 = vpop.f32.mrf.mxu2  ;;  %v1083_v59 = vpop.f32.mrf.mxu3 }
 0x119   : > { %v1331_v61 = vsel %vm1290_vm5, %v1319_v28, 0.0  ;;  %v1011_v62 = vadd.f32 %v1000_v58, %v928_v57  ;;  %v919_v52 = vpop.f32.mrf.mxu1 }
 0x11a   : > { %v1332_v18 = vadd.f32 %v1331_v61, %v1330_v43  ;;  %v929_v2 = vadd.f32 %v919_v52, %v735_v44 }
 0x11b   : > { %v1094_v34 = vadd.f32 %v1083_v59, %v1011_v62  ;;  %v1279_v6 = vpop.f32.mrf.mxu0 }
 0x11d   : > { %v1288_v63 = vadd.f32 %v1277_v48, %v1094_v34 }
 0x11f   : > { %v1302_v0 = vsel %vm1290_vm5, %v1288_v63, 0.0  ;;  %v1320_v1 = vmul.f32 %v1288_v63, %v1288_v63  ;;  %1350 = vxpose.xlu0.b32.cont [7/8] (short) (narrow) %v1288_v63, 8 }
 0x120   : > { %v1303_v3 = vadd.f32 %v1302_v0, %v1301_v47  ;;  %v1002_v4 = vpop.f32.mrf.mxu2  ;;  %v1085_v5 = vpop.f32.mrf.mxu3 }
 0x121   : > { %v1333_v46 = vsel %vm1290_vm5, %v1320_v1, 0.0  ;;  %v1012_v53 = vadd.f32 %v1002_v4, %v929_v2 }
 0x122   : > { %v1334_v35 = vadd.f32 %v1333_v46, %v1332_v18 }
 0x123   : > { %v1095_v37 = vadd.f32 %v1085_v5, %v1012_v53 }
 0x125   : > { %v1289_v32 = vadd.f32 %v1279_v6, %v1095_v37 }
 0x127   : > { %v1304_v7 = vsel %vm1290_vm5, %v1289_v32, 0.0  ;;  %v1321_v8 = vmul.f32 %v1289_v32, %v1289_v32  ;;  %1351 = vxpose.xlu0.b32.end [8/8] (short) (narrow) %v1289_v32, 8 }
 0x128   : > { %v1305_v50 = vadd.f32 %v1304_v7, %v1303_v3 }
 0x129   : > { %v1335_v10 = vsel %vm1290_vm5, %v1321_v8, 0.0 }
 0x12a   : > { %v1306_v11 = vrot.slane %v1305_v50, 4  ;;  %v1336_v12 = vadd.f32 %v1335_v10, %v1334_v35 }
 0x12c   : > { %v1307_v13 = vadd.f32 %v1306_v11, %v1305_v50  ;;  %v1337_v38 = vrot.slane %v1336_v12, 4 }
 0x12e   : > { %v1308_v16 = vrot.slane %v1307_v13, 2  ;;  %v1338_v19 = vadd.f32 %v1337_v38, %v1336_v12 }
 0x130   : > { %v1309_v20 = vadd.f32 %v1308_v16, %v1307_v13  ;;  %v1339_v21 = vrot.slane %v1338_v19, 2 }
 0x132   : > { %v1310_v17 = vrot.slane %v1309_v20, 1  ;;  %v1340_v39 = vadd.f32 %v1339_v21, %v1338_v19 }
 0x134   : > { %v1311_v22 = vadd.f32 %v1310_v17, %v1309_v20  ;;  %v1341_v41 = vrot.slane %v1340_v39, 1 }
 0x136   : > { %1313 = vst.msk [vmem:[%s221_s18] sm:$0x1] %vm1312_vm6, %v1311_v22  ;;  %v1342_v36 = vadd.f32 %v1341_v41, %v1340_v39 }
 0x138   : > { %1343 = vst.msk [vmem:[%s221_s18 + $0x1] sm:$0x1] %vm1312_vm6, %v1342_v36 }
 0x193   : > { %v1360_v23 = vpop.trf.xlu0 }
 0x194   : > { %1377 = vst.msk [vmem:[%s214_s22] sm:$0xff] %vm1376_vm7, %v1360_v23 }
 0x195 PF: > { %s14_s14 = sadd.s32 1, %s1796_s14   ;;  %s2169_s12 = smov %s1792_s13 }
 0x196   : > { %p11_p5 = scmp.ge.s32.totalorder %s14_s14, 4   ;;  %s2170_s13 = smov %s2172_s15 }
 0x198   :  { %13 = sbr.rel (!%p11_p5) target bundleno = 2 (0x2), region = 83 }

</bundles_post_ra>
